<compile_context>
chip_gen: v7x
topology: tpu7x:2x2x1
jax: 0.10.0
libtpu: 0.0.40
codegen_flags: <defaults>
</compile_context>

<pallas_src>
import jax
import jax.numpy as jnp
from jax.experimental import pallas as pl
from jax.experimental.pallas import tpu as pltpu

NEG_SLOPE = 0.01        # F.leaky_relu default negative_slope
LANE = 128              # TPU lane width; all feature dims padded to this
HEAD_WIDTH = 2 * LANE   # [projector (128) | classifier padded to 128]
SUBLANE_PAD = 16        # pad N / E to a multiple of 16 (covers f32 and bf16 tiling)


def _leaky_relu(x):
    return jnp.where(x > 0, x, NEG_SLOPE * x)


def _gine_layer(x, edge_emb, G, S, Wa, ba, Wb, bb):
    """GINEConv (eps=0) + LeakyReLU, all lane-dense (128-wide) on the MXU.

    out = LeakyReLU( MLP( x + sum_{j->i} relu(x_j + Lin_e(edge_attr)) ) )
    with MLP = Linear -> ReLU -> Linear.  Gather / scatter-add run as bf16
    one-hot matmuls with f32 accumulation.
    """
    x_src = jnp.dot(G, x.astype(jnp.bfloat16),
                    preferred_element_type=jnp.float32)          # (E, 128) gather x[src]
    msg = jnp.maximum(x_src + edge_emb, 0.0)                      # ReLU messages
    aggr = jnp.dot(S, msg.astype(jnp.bfloat16),
                   preferred_element_type=jnp.float32)            # (N, 128) scatter-add
    h = x + aggr                                                  # (1 + eps) * x + aggr, eps = 0
    h = jnp.maximum(jnp.dot(h, Wa, preferred_element_type=jnp.float32) + ba, 0.0)
    h = jnp.dot(h, Wb, preferred_element_type=jnp.float32) + bb
    return _leaky_relu(h)


def model_kernel(x_ref, ea_ref, g_ref, s_ref, p_ref, icnt_ref,
                 we_ref, be_ref,
                 w1a, b1a, w1b, b1b,
                 w2a, b2a, w2b, b2b,
                 w3a, b3a, w3b, b3b,
                 wh_ref, bh_ref,
                 out_ref):
    x = x_ref[...]                       # (N, 128) f32
    G = g_ref[...]                       # (E, N)  bf16 one-hot (source gather)
    S = s_ref[...]                       # (N, E)  bf16 one-hot (target scatter)

    # All three layers' edge embeddings in one lane-dense matmul -> (E, 384).
    edge_emb_all = (jnp.dot(ea_ref[...], we_ref[...],
                            preferred_element_type=jnp.float32) + be_ref[...])

    x = _gine_layer(x, edge_emb_all[:, 0 * LANE:1 * LANE], G, S,
                    w1a[...], b1a[...], w1b[...], b1b[...])
    x = _gine_layer(x, edge_emb_all[:, 1 * LANE:2 * LANE], G, S,
                    w2a[...], b2a[...], w2b[...], b2b[...])
    x = _gine_layer(x, edge_emb_all[:, 2 * LANE:3 * LANE], G, S,
                    w3a[...], b3a[...], w3b[...], b3b[...])

    # TODO(synk): F.dropout(p=0.3) is the identity in inference mode (training=False).

    # global_mean_pool: 0/1 bf16 pool matmul, exact mean via precomputed 1/count.
    pooled = (jnp.dot(p_ref[...], x.astype(jnp.bfloat16),
                      preferred_element_type=jnp.float32) * icnt_ref[...])  # (B, 128)

    # Fused [projector | classifier] head: one lane-dense (128, 256) matmul.
    combined = jnp.dot(pooled, wh_ref[...],
                       preferred_element_type=jnp.float32) + bh_ref[...]    # (B, 256)

    # F.normalize(dim=-1) on the projector half via a single EUP rsqrt:
    # 1 / max(||proj||, 1e-12) == rsqrt(max(||proj||^2, 1e-24)).
    proj = combined[:, :LANE]
    ssq = jnp.sum(proj * proj, axis=-1, keepdims=True)
    inv_norm = jax.lax.rsqrt(jnp.maximum(ssq, 1e-24))
    lane = jax.lax.broadcasted_iota(jnp.int32, combined.shape, 1)
    out_ref[...] = combined * jnp.where(lane < LANE, inv_norm, 1.0)


def _pad2(a, rows, cols):
    return jnp.pad(a, ((0, rows - a.shape[0]), (0, cols - a.shape[1])))


def _round_up(n, m):
    return ((n + m - 1) // m) * m


def _pack_params(params):
    """Pad all PyTorch-shaped weights to 128 lanes and fuse edge-lins / head."""
    (We1, be1, W1a, b1a, W1b, b1b,
     We2, be2, W2a, b2a, W2b, b2b,
     We3, be3, W3a, b3a, W3b, b3b,
     Wc, bc, Wp, bp) = params

    We_all = jnp.concatenate([_pad2(We1, LANE, LANE),
                              _pad2(We2, LANE, LANE),
                              _pad2(We3, LANE, LANE)], axis=1)        # (128, 384)
    be_all = jnp.concatenate([_pad2(be1, 1, LANE),
                              _pad2(be2, 1, LANE),
                              _pad2(be3, 1, LANE)], axis=1)           # (1, 384)

    mlp = []
    for W_a, b_a, W_b, b_b in ((W1a, b1a, W1b, b1b),
                               (W2a, b2a, W2b, b2b),
                               (W3a, b3a, W3b, b3b)):
        mlp += [_pad2(W_a, LANE, LANE), _pad2(b_a, 1, LANE),
                _pad2(W_b, LANE, LANE), _pad2(b_b, 1, LANE)]

    W_head = jnp.concatenate([_pad2(Wp, LANE, LANE),
                              _pad2(Wc, LANE, LANE)], axis=1)         # (128, 256)
    b_head = jnp.concatenate([_pad2(bp, 1, LANE),
                              _pad2(bc, 1, LANE)], axis=1)            # (1, 256)

    return [We_all, be_all] + mlp + [W_head, b_head]


def run_custom_model(x, edge_index, edge_attr, batch, num_graphs, params, output_dim):
    """Build one-hot gather/scatter/pool matrices + padded params, run the kernel."""
    N = x.shape[0]
    E = edge_index.shape[1]
    Np = _round_up(N, SUBLANE_PAD)
    Ep = _round_up(E, SUBLANE_PAD)

    # Pad indices with out-of-range values -> all-zero one-hot rows/cols (no effect).
    src = jnp.concatenate([edge_index[0], jnp.full((Ep - E,), -1, jnp.int32)])
    tgt = jnp.concatenate([edge_index[1], jnp.full((Ep - E,), -1, jnp.int32)])
    batch_p = jnp.concatenate([batch.astype(jnp.int32),
                               jnp.full((Np - N,), num_graphs, jnp.int32)])

    # 0/1 matrices stored in bf16 (values exact); mean scale kept in f32.
    G = jax.nn.one_hot(src, Np, dtype=jnp.bfloat16)                 # (E, N)
    S = jax.nn.one_hot(tgt, Np, dtype=jnp.bfloat16).T               # (N, E)
    P = jax.nn.one_hot(batch_p, num_graphs, dtype=jnp.bfloat16).T   # (B, N)
    counts = jnp.maximum(
        jnp.sum(jax.nn.one_hot(batch_p, num_graphs, dtype=jnp.float32), axis=0),
        1.0).reshape(num_graphs, 1)
    inv_counts = 1.0 / counts                                       # (B, 1) f32

    x_pad = _pad2(x.astype(jnp.float32), Np, LANE)                  # (N, 128)
    ea_pad = _pad2(edge_attr.astype(jnp.float32), Ep, LANE)         # (E, 128)

    inputs = [x_pad, ea_pad, G, S, P, inv_counts] + _pack_params(params)

    # Advisory cost estimate for the XLA scheduler.
    flops = (2 * Ep * LANE * 3 * LANE                      # fused edge embeddings
             + 3 * (2 * Ep * Np * LANE * 2                 # gather + scatter per layer
                    + 2 * Np * LANE * LANE * 2)            # 2-layer MLP per layer
             + 2 * num_graphs * Np * LANE                  # pooling
             + 2 * num_graphs * LANE * HEAD_WIDTH)         # fused head
    bytes_accessed = (sum(int(a.size) * a.dtype.itemsize for a in inputs)
                      + num_graphs * HEAD_WIDTH * 4)

    out = pl.pallas_call(
        model_kernel,
        out_shape=jax.ShapeDtypeStruct((num_graphs, HEAD_WIDTH), jnp.float32),
        in_specs=[pl.BlockSpec(memory_space=pltpu.MemorySpace.VMEM)] * len(inputs),
        out_specs=pl.BlockSpec(memory_space=pltpu.MemorySpace.VMEM),
        compiler_params=pltpu.CompilerParams(vmem_limit_bytes=32 * 1024 * 1024),
        cost_estimate=pl.CostEstimate(flops=flops,
                                      transcendentals=num_graphs,
                                      bytes_accessed=bytes_accessed),
    )(*inputs)

    features = out[:, :LANE]                     # F.normalize(projector(pooled))
    logits = out[:, LANE:LANE + output_dim]      # classifier(pooled)
    return logits, features


def _linear_params(key, fan_in, fan_out):
    kw, kb = jax.random.split(key)
    scale = 1.0 / jnp.sqrt(jnp.float32(fan_in))
    W = jax.random.uniform(kw, (fan_in, fan_out), jnp.float32, -scale, scale)
    b = jax.random.uniform(kb, (1, fan_out), jnp.float32, -scale, scale)
    return W, b


def init_params(key, input_dim, hidden_dim_1, hidden_dim_2, output_dim, edge_dim):
    keys = jax.random.split(key, 11)
    params = []
    # conv1: edge lin (edge_dim -> input_dim), MLP (input_dim -> h1 -> h1)
    params += _linear_params(keys[0], edge_dim, input_dim)
    params += _linear_params(keys[1], input_dim, hidden_dim_1)
    params += _linear_params(keys[2], hidden_dim_1, hidden_dim_1)
    # conv2: edge lin (edge_dim -> h1), MLP (h1 -> h2 -> h2)
    params += _linear_params(keys[3], edge_dim, hidden_dim_1)
    params += _linear_params(keys[4], hidden_dim_1, hidden_dim_2)
    params += _linear_params(keys[5], hidden_dim_2, hidden_dim_2)
    # conv3: edge lin (edge_dim -> h2), MLP (h2 -> h1 -> h1)
    params += _linear_params(keys[6], edge_dim, hidden_dim_2)
    params += _linear_params(keys[7], hidden_dim_2, hidden_dim_1)
    params += _linear_params(keys[8], hidden_dim_1, hidden_dim_1)
    # classifier (h1 -> output_dim), projector (h1 -> 128)
    params += _linear_params(keys[9], hidden_dim_1, output_dim)
    params += _linear_params(keys[10], hidden_dim_1, 128)
    return params


if __name__ == "__main__":
    # Small synthetic graph batch: 2 graphs, 8 nodes each.
    INPUT_DIM, H1, H2, OUT_DIM, EDGE_DIM = 8, 32, 16, 4, 6
    N, E_PER_GRAPH, NUM_GRAPHS = 16, 16, 2

    key = jax.random.PRNGKey(0)
    k_x, k_e, k_s1, k_t1, k_s2, k_t2, k_p = jax.random.split(key, 7)

    x = jax.random.normal(k_x, (N, INPUT_DIM), jnp.float32)
    edge_attr = jax.random.normal(k_e, (2 * E_PER_GRAPH, EDGE_DIM), jnp.float32)

    # Edges stay within their own graph (nodes 0-7 for graph 0, 8-15 for graph 1).
    src = jnp.concatenate([
        jax.random.randint(k_s1, (E_PER_GRAPH,), 0, 8),
        jax.random.randint(k_s2, (E_PER_GRAPH,), 8, 16),
    ])
    tgt = jnp.concatenate([
        jax.random.randint(k_t1, (E_PER_GRAPH,), 0, 8),
        jax.random.randint(k_t2, (E_PER_GRAPH,), 8, 16),
    ])
    edge_index = jnp.stack([src, tgt], axis=0).astype(jnp.int32)   # (2, E)
    batch = jnp.concatenate([jnp.zeros(8, jnp.int32), jnp.ones(8, jnp.int32)])

    params = init_params(k_p, INPUT_DIM, H1, H2, OUT_DIM, EDGE_DIM)

    logits, features = run_custom_model(
        x, edge_index, edge_attr, batch, NUM_GRAPHS, params, OUT_DIM)
    jax.block_until_ready((logits, features))

    assert logits.shape == (NUM_GRAPHS, OUT_DIM)
    assert features.shape == (NUM_GRAPHS, 128)
    print("KERNEL_OK")
</pallas_src>

<mosaic_0001>
module attributes {stable_mosaic.version = 11 : i64} {
  func.func @model_kernel(%arg0: memref<16x128xf32, #tpu.memory_space<vmem>>, %arg1: memref<32x128xf32, #tpu.memory_space<vmem>>, %arg2: memref<32x16xbf16, #tpu.memory_space<vmem>>, %arg3: memref<16x32xbf16, #tpu.memory_space<vmem>>, %arg4: memref<2x16xbf16, #tpu.memory_space<vmem>>, %arg5: memref<2x1xf32, #tpu.memory_space<vmem>>, %arg6: memref<128x384xf32, #tpu.memory_space<vmem>>, %arg7: memref<1x384xf32, #tpu.memory_space<vmem>>, %arg8: memref<128x128xf32, #tpu.memory_space<vmem>>, %arg9: memref<1x128xf32, #tpu.memory_space<vmem>>, %arg10: memref<128x128xf32, #tpu.memory_space<vmem>>, %arg11: memref<1x128xf32, #tpu.memory_space<vmem>>, %arg12: memref<128x128xf32, #tpu.memory_space<vmem>>, %arg13: memref<1x128xf32, #tpu.memory_space<vmem>>, %arg14: memref<128x128xf32, #tpu.memory_space<vmem>>, %arg15: memref<1x128xf32, #tpu.memory_space<vmem>>, %arg16: memref<128x128xf32, #tpu.memory_space<vmem>>, %arg17: memref<1x128xf32, #tpu.memory_space<vmem>>, %arg18: memref<128x128xf32, #tpu.memory_space<vmem>>, %arg19: memref<1x128xf32, #tpu.memory_space<vmem>>, %arg20: memref<128x256xf32, #tpu.memory_space<vmem>>, %arg21: memref<1x256xf32, #tpu.memory_space<vmem>>, %arg22: memref<2x256xf32, #tpu.memory_space<vmem>>) attributes {dimension_semantics = [], scalar_prefetch = 0 : i64, scratch_operands = 0 : i64, tpu.core_type = #tpu.core_type<tc>} {
    %c0 = arith.constant 0 : index
    %c0_0 = arith.constant 0 : index
    %0 = vector.load %arg0[%c0, %c0_0] : memref<16x128xf32, #tpu.memory_space<vmem>>, vector<16x128xf32>
    %c0_1 = arith.constant 0 : index
    %c0_2 = arith.constant 0 : index
    %1 = vector.load %arg2[%c0_1, %c0_2] : memref<32x16xbf16, #tpu.memory_space<vmem>>, vector<32x16xbf16>
    %c0_3 = arith.constant 0 : index
    %c0_4 = arith.constant 0 : index
    %2 = vector.load %arg3[%c0_3, %c0_4] : memref<16x32xbf16, #tpu.memory_space<vmem>>, vector<16x32xbf16>
    %c0_5 = arith.constant 0 : index
    %c0_6 = arith.constant 0 : index
    %3 = vector.load %arg1[%c0_5, %c0_6] : memref<32x128xf32, #tpu.memory_space<vmem>>, vector<32x128xf32>
    %c0_7 = arith.constant 0 : index
    %c0_8 = arith.constant 0 : index
    %4 = vector.load %arg6[%c0_7, %c0_8] : memref<128x384xf32, #tpu.memory_space<vmem>>, vector<128x384xf32>
    %cst = arith.constant dense<0.000000e+00> : vector<32x384xf32>
    %5 = tpu.matmul %3, %4, %cst {dimension_numbers = #tpu.dot_dimension_numbers<[1], [0], [0], [1], [0, 0, 1, 1], [], []>} : vector<32x128xf32>, vector<128x384xf32>, vector<32x384xf32> -> vector<32x384xf32>
    %c0_9 = arith.constant 0 : index
    %c0_10 = arith.constant 0 : index
    %6 = vector.load %arg7[%c0_9, %c0_10] : memref<1x384xf32, #tpu.memory_space<vmem>>, vector<1x384xf32>
    %7 = vector.broadcast %6 : vector<1x384xf32> to vector<32x384xf32>
    %8 = arith.addf %5, %7 : vector<32x384xf32>
    %9 = vector.extract_strided_slice %8 {offsets = [0, 0], sizes = [32, 128], strides = [1, 1]} : vector<32x384xf32> to vector<32x128xf32>
    %c0_11 = arith.constant 0 : index
    %c0_12 = arith.constant 0 : index
    %10 = vector.load %arg8[%c0_11, %c0_12] : memref<128x128xf32, #tpu.memory_space<vmem>>, vector<128x128xf32>
    %c0_13 = arith.constant 0 : index
    %c0_14 = arith.constant 0 : index
    %11 = vector.load %arg9[%c0_13, %c0_14] : memref<1x128xf32, #tpu.memory_space<vmem>>, vector<1x128xf32>
    %c0_15 = arith.constant 0 : index
    %c0_16 = arith.constant 0 : index
    %12 = vector.load %arg10[%c0_15, %c0_16] : memref<128x128xf32, #tpu.memory_space<vmem>>, vector<128x128xf32>
    %c0_17 = arith.constant 0 : index
    %c0_18 = arith.constant 0 : index
    %13 = vector.load %arg11[%c0_17, %c0_18] : memref<1x128xf32, #tpu.memory_space<vmem>>, vector<1x128xf32>
    %14 = arith.truncf %0 : vector<16x128xf32> to vector<16x128xbf16>
    %cst_19 = arith.constant dense<0.000000e+00> : vector<32x128xf32>
    %15 = tpu.matmul %1, %14, %cst_19 {dimension_numbers = #tpu.dot_dimension_numbers<[1], [0], [0], [1], [0, 0, 1, 1], [], []>} : vector<32x16xbf16>, vector<16x128xbf16>, vector<32x128xf32> -> vector<32x128xf32>
    %16 = arith.addf %15, %9 : vector<32x128xf32>
    %cst_20 = arith.constant 0.000000e+00 : f32
    %17 = vector.broadcast %cst_20 : f32 to vector<32x128xf32>
    %18 = arith.maximumf %16, %17 : vector<32x128xf32>
    %19 = arith.truncf %18 : vector<32x128xf32> to vector<32x128xbf16>
    %cst_21 = arith.constant dense<0.000000e+00> : vector<16x128xf32>
    %20 = tpu.matmul %2, %19, %cst_21 {dimension_numbers = #tpu.dot_dimension_numbers<[1], [0], [0], [1], [0, 0, 1, 1], [], []>} : vector<16x32xbf16>, vector<32x128xbf16>, vector<16x128xf32> -> vector<16x128xf32>
    %21 = arith.addf %0, %20 : vector<16x128xf32>
    %cst_22 = arith.constant dense<0.000000e+00> : vector<16x128xf32>
    %22 = tpu.matmul %21, %10, %cst_22 {dimension_numbers = #tpu.dot_dimension_numbers<[1], [0], [0], [1], [0, 0, 1, 1], [], []>} : vector<16x128xf32>, vector<128x128xf32>, vector<16x128xf32> -> vector<16x128xf32>
    %23 = vector.broadcast %11 : vector<1x128xf32> to vector<16x128xf32>
    %24 = arith.addf %22, %23 : vector<16x128xf32>
    %cst_23 = arith.constant 0.000000e+00 : f32
    %25 = vector.broadcast %cst_23 : f32 to vector<16x128xf32>
    %26 = arith.maximumf %24, %25 : vector<16x128xf32>
    %cst_24 = arith.constant dense<0.000000e+00> : vector<16x128xf32>
    %27 = tpu.matmul %26, %12, %cst_24 {dimension_numbers = #tpu.dot_dimension_numbers<[1], [0], [0], [1], [0, 0, 1, 1], [], []>} : vector<16x128xf32>, vector<128x128xf32>, vector<16x128xf32> -> vector<16x128xf32>
    %28 = vector.broadcast %13 : vector<1x128xf32> to vector<16x128xf32>
    %29 = arith.addf %27, %28 : vector<16x128xf32>
    %cst_25 = arith.constant 0.000000e+00 : f32
    %30 = vector.broadcast %cst_25 : f32 to vector<16x128xf32>
    %31 = arith.cmpf ogt, %29, %30 : vector<16x128xf32>
    %cst_26 = arith.constant 0.00999999977 : f32
    %32 = vector.broadcast %cst_26 : f32 to vector<16x128xf32>
    %33 = arith.mulf %32, %29 : vector<16x128xf32>
    %34 = arith.select %31, %29, %33 : vector<16x128xi1>, vector<16x128xf32>
    %35 = vector.extract_strided_slice %8 {offsets = [0, 128], sizes = [32, 128], strides = [1, 1]} : vector<32x384xf32> to vector<32x128xf32>
    %c0_27 = arith.constant 0 : index
    %c0_28 = arith.constant 0 : index
    %36 = vector.load %arg12[%c0_27, %c0_28] : memref<128x128xf32, #tpu.memory_space<vmem>>, vector<128x128xf32>
    %c0_29 = arith.constant 0 : index
    %c0_30 = arith.constant 0 : index
    %37 = vector.load %arg13[%c0_29, %c0_30] : memref<1x128xf32, #tpu.memory_space<vmem>>, vector<1x128xf32>
    %c0_31 = arith.constant 0 : index
    %c0_32 = arith.constant 0 : index
    %38 = vector.load %arg14[%c0_31, %c0_32] : memref<128x128xf32, #tpu.memory_space<vmem>>, vector<128x128xf32>
    %c0_33 = arith.constant 0 : index
    %c0_34 = arith.constant 0 : index
    %39 = vector.load %arg15[%c0_33, %c0_34] : memref<1x128xf32, #tpu.memory_space<vmem>>, vector<1x128xf32>
    %40 = arith.truncf %34 : vector<16x128xf32> to vector<16x128xbf16>
    %cst_35 = arith.constant dense<0.000000e+00> : vector<32x128xf32>
    %41 = tpu.matmul %1, %40, %cst_35 {dimension_numbers = #tpu.dot_dimension_numbers<[1], [0], [0], [1], [0, 0, 1, 1], [], []>} : vector<32x16xbf16>, vector<16x128xbf16>, vector<32x128xf32> -> vector<32x128xf32>
    %42 = arith.addf %41, %35 : vector<32x128xf32>
    %cst_36 = arith.constant 0.000000e+00 : f32
    %43 = vector.broadcast %cst_36 : f32 to vector<32x128xf32>
    %44 = arith.maximumf %42, %43 : vector<32x128xf32>
    %45 = arith.truncf %44 : vector<32x128xf32> to vector<32x128xbf16>
    %cst_37 = arith.constant dense<0.000000e+00> : vector<16x128xf32>
    %46 = tpu.matmul %2, %45, %cst_37 {dimension_numbers = #tpu.dot_dimension_numbers<[1], [0], [0], [1], [0, 0, 1, 1], [], []>} : vector<16x32xbf16>, vector<32x128xbf16>, vector<16x128xf32> -> vector<16x128xf32>
    %47 = arith.addf %34, %46 : vector<16x128xf32>
    %cst_38 = arith.constant dense<0.000000e+00> : vector<16x128xf32>
    %48 = tpu.matmul %47, %36, %cst_38 {dimension_numbers = #tpu.dot_dimension_numbers<[1], [0], [0], [1], [0, 0, 1, 1], [], []>} : vector<16x128xf32>, vector<128x128xf32>, vector<16x128xf32> -> vector<16x128xf32>
    %49 = vector.broadcast %37 : vector<1x128xf32> to vector<16x128xf32>
    %50 = arith.addf %48, %49 : vector<16x128xf32>
    %cst_39 = arith.constant 0.000000e+00 : f32
    %51 = vector.broadcast %cst_39 : f32 to vector<16x128xf32>
    %52 = arith.maximumf %50, %51 : vector<16x128xf32>
    %cst_40 = arith.constant dense<0.000000e+00> : vector<16x128xf32>
    %53 = tpu.matmul %52, %38, %cst_40 {dimension_numbers = #tpu.dot_dimension_numbers<[1], [0], [0], [1], [0, 0, 1, 1], [], []>} : vector<16x128xf32>, vector<128x128xf32>, vector<16x128xf32> -> vector<16x128xf32>
    %54 = vector.broadcast %39 : vector<1x128xf32> to vector<16x128xf32>
    %55 = arith.addf %53, %54 : vector<16x128xf32>
    %cst_41 = arith.constant 0.000000e+00 : f32
    %56 = vector.broadcast %cst_41 : f32 to vector<16x128xf32>
    %57 = arith.cmpf ogt, %55, %56 : vector<16x128xf32>
    %cst_42 = arith.constant 0.00999999977 : f32
    %58 = vector.broadcast %cst_42 : f32 to vector<16x128xf32>
    %59 = arith.mulf %58, %55 : vector<16x128xf32>
    %60 = arith.select %57, %55, %59 : vector<16x128xi1>, vector<16x128xf32>
    %61 = vector.extract_strided_slice %8 {offsets = [0, 256], sizes = [32, 128], strides = [1, 1]} : vector<32x384xf32> to vector<32x128xf32>
    %c0_43 = arith.constant 0 : index
    %c0_44 = arith.constant 0 : index
    %62 = vector.load %arg16[%c0_43, %c0_44] : memref<128x128xf32, #tpu.memory_space<vmem>>, vector<128x128xf32>
    %c0_45 = arith.constant 0 : index
    %c0_46 = arith.constant 0 : index
    %63 = vector.load %arg17[%c0_45, %c0_46] : memref<1x128xf32, #tpu.memory_space<vmem>>, vector<1x128xf32>
    %c0_47 = arith.constant 0 : index
    %c0_48 = arith.constant 0 : index
    %64 = vector.load %arg18[%c0_47, %c0_48] : memref<128x128xf32, #tpu.memory_space<vmem>>, vector<128x128xf32>
    %c0_49 = arith.constant 0 : index
    %c0_50 = arith.constant 0 : index
    %65 = vector.load %arg19[%c0_49, %c0_50] : memref<1x128xf32, #tpu.memory_space<vmem>>, vector<1x128xf32>
    %66 = arith.truncf %60 : vector<16x128xf32> to vector<16x128xbf16>
    %cst_51 = arith.constant dense<0.000000e+00> : vector<32x128xf32>
    %67 = tpu.matmul %1, %66, %cst_51 {dimension_numbers = #tpu.dot_dimension_numbers<[1], [0], [0], [1], [0, 0, 1, 1], [], []>} : vector<32x16xbf16>, vector<16x128xbf16>, vector<32x128xf32> -> vector<32x128xf32>
    %68 = arith.addf %67, %61 : vector<32x128xf32>
    %cst_52 = arith.constant 0.000000e+00 : f32
    %69 = vector.broadcast %cst_52 : f32 to vector<32x128xf32>
    %70 = arith.maximumf %68, %69 : vector<32x128xf32>
    %71 = arith.truncf %70 : vector<32x128xf32> to vector<32x128xbf16>
    %cst_53 = arith.constant dense<0.000000e+00> : vector<16x128xf32>
    %72 = tpu.matmul %2, %71, %cst_53 {dimension_numbers = #tpu.dot_dimension_numbers<[1], [0], [0], [1], [0, 0, 1, 1], [], []>} : vector<16x32xbf16>, vector<32x128xbf16>, vector<16x128xf32> -> vector<16x128xf32>
    %73 = arith.addf %60, %72 : vector<16x128xf32>
    %cst_54 = arith.constant dense<0.000000e+00> : vector<16x128xf32>
    %74 = tpu.matmul %73, %62, %cst_54 {dimension_numbers = #tpu.dot_dimension_numbers<[1], [0], [0], [1], [0, 0, 1, 1], [], []>} : vector<16x128xf32>, vector<128x128xf32>, vector<16x128xf32> -> vector<16x128xf32>
    %75 = vector.broadcast %63 : vector<1x128xf32> to vector<16x128xf32>
    %76 = arith.addf %74, %75 : vector<16x128xf32>
    %cst_55 = arith.constant 0.000000e+00 : f32
    %77 = vector.broadcast %cst_55 : f32 to vector<16x128xf32>
    %78 = arith.maximumf %76, %77 : vector<16x128xf32>
    %cst_56 = arith.constant dense<0.000000e+00> : vector<16x128xf32>
    %79 = tpu.matmul %78, %64, %cst_56 {dimension_numbers = #tpu.dot_dimension_numbers<[1], [0], [0], [1], [0, 0, 1, 1], [], []>} : vector<16x128xf32>, vector<128x128xf32>, vector<16x128xf32> -> vector<16x128xf32>
    %80 = vector.broadcast %65 : vector<1x128xf32> to vector<16x128xf32>
    %81 = arith.addf %79, %80 : vector<16x128xf32>
    %cst_57 = arith.constant 0.000000e+00 : f32
    %82 = vector.broadcast %cst_57 : f32 to vector<16x128xf32>
    %83 = arith.cmpf ogt, %81, %82 : vector<16x128xf32>
    %cst_58 = arith.constant 0.00999999977 : f32
    %84 = vector.broadcast %cst_58 : f32 to vector<16x128xf32>
    %85 = arith.mulf %84, %81 : vector<16x128xf32>
    %86 = arith.select %83, %81, %85 : vector<16x128xi1>, vector<16x128xf32>
    %c0_59 = arith.constant 0 : index
    %c0_60 = arith.constant 0 : index
    %87 = vector.load %arg4[%c0_59, %c0_60] : memref<2x16xbf16, #tpu.memory_space<vmem>>, vector<2x16xbf16>
    %88 = arith.truncf %86 : vector<16x128xf32> to vector<16x128xbf16>
    %cst_61 = arith.constant dense<0.000000e+00> : vector<2x128xf32>
    %89 = tpu.matmul %87, %88, %cst_61 {dimension_numbers = #tpu.dot_dimension_numbers<[1], [0], [0], [1], [0, 0, 1, 1], [], []>} : vector<2x16xbf16>, vector<16x128xbf16>, vector<2x128xf32> -> vector<2x128xf32>
    %c0_62 = arith.constant 0 : index
    %c0_63 = arith.constant 0 : index
    %90 = vector.load %arg5[%c0_62, %c0_63] : memref<2x1xf32, #tpu.memory_space<vmem>>, vector<2x1xf32>
    %91 = vector.broadcast %90 : vector<2x1xf32> to vector<2x128xf32>
    %92 = arith.mulf %89, %91 : vector<2x128xf32>
    %c0_64 = arith.constant 0 : index
    %c0_65 = arith.constant 0 : index
    %93 = vector.load %arg20[%c0_64, %c0_65] : memref<128x256xf32, #tpu.memory_space<vmem>>, vector<128x256xf32>
    %cst_66 = arith.constant dense<0.000000e+00> : vector<2x256xf32>
    %94 = tpu.matmul %92, %93, %cst_66 {dimension_numbers = #tpu.dot_dimension_numbers<[1], [0], [0], [1], [0, 0, 1, 1], [], []>} : vector<2x128xf32>, vector<128x256xf32>, vector<2x256xf32> -> vector<2x256xf32>
    %c0_67 = arith.constant 0 : index
    %c0_68 = arith.constant 0 : index
    %95 = vector.load %arg21[%c0_67, %c0_68] : memref<1x256xf32, #tpu.memory_space<vmem>>, vector<1x256xf32>
    %96 = vector.broadcast %95 : vector<1x256xf32> to vector<2x256xf32>
    %97 = arith.addf %94, %96 : vector<2x256xf32>
    %98 = vector.extract_strided_slice %97 {offsets = [0, 0], sizes = [2, 128], strides = [1, 1]} : vector<2x256xf32> to vector<2x128xf32>
    %99 = arith.mulf %98, %98 : vector<2x128xf32>
    %cst_69 = arith.constant dense<0.000000e+00> : vector<2xf32>
    %100 = vector.multi_reduction <add>, %99, %cst_69 [1] : vector<2x128xf32> to vector<2xf32>
    %101 = vector.shape_cast %100 : vector<2xf32> to vector<2x1xf32>
    %cst_70 = arith.constant 1.000000e-24 : f32
    %102 = vector.broadcast %cst_70 : f32 to vector<2x1xf32>
    %103 = arith.maximumf %101, %102 : vector<2x1xf32>
    %104 = math.rsqrt %103 : vector<2x1xf32>
    %105 = tpu.iota {dimensions = array<i32: 1>} : vector<2x256xi32>
    %c128_i32 = arith.constant 128 : i32
    %106 = vector.broadcast %c128_i32 : i32 to vector<2x256xi32>
    %107 = arith.cmpi slt, %105, %106 : vector<2x256xi32>
    %cst_71 = arith.constant 1.000000e+00 : f32
    %108 = vector.shape_cast %104 : vector<2x1xf32> to vector<2x1xf32>
    %109 = vector.broadcast %108 : vector<2x1xf32> to vector<2x256xf32>
    %110 = vector.broadcast %cst_71 : f32 to vector<2x256xf32>
    %111 = arith.select %107, %109, %110 : vector<2x256xi1>, vector<2x256xf32>
    %112 = arith.mulf %97, %111 : vector<2x256xf32>
    %c0_72 = arith.constant 0 : index
    %c0_73 = arith.constant 0 : index
    %113 = vector.load %arg22[%c0_72, %c0_73] : memref<2x256xf32, #tpu.memory_space<vmem>>, vector<2x256xf32>
    tpu.vector_store %arg22[%c0_72, %c0_73], %112 {strides = array<i32>} : memref<2x256xf32, #tpu.memory_space<vmem>>, vector<2x256xf32>,
    return
  }
}

</mosaic_0001>

<bundles_post_ra>
// kernel: tpu_custom_call.1
= control target key start
LH: loop header
LB: loop body
LE: loop exit
PB: predicated region body
PF: predicated region fallthrough
CT: control target
= control target key end

     0   :  { %s3043_s0 = inlined_call_operand.vmem [shape: f32[16,128], index: 0, kind: input, shape index: {}]   ;;  %s3044_s1 = inlined_call_operand.hbm [shape: f32[32,128], index: 1, kind: input, shape index: {}]   ;;  %s3045_s2 = inlined_call_operand.vmem [shape: bf16[32,16], index: 2, kind: input, shape index: {}]   ;;  %s3046_s3 = inlined_call_operand.vmem [shape: bf16[16,32], index: 3, kind: input, shape index: {}]   ;;  %s3047_s4 = inlined_call_operand.vmem [shape: bf16[2,16], index: 4, kind: input, shape index: {}]   ;;  %s3048_s5 = inlined_call_operand.vmem [shape: f32[2,1], index: 5, kind: input, shape index: {}]   ;;  %s3049_s6 = inlined_call_operand.hbm [shape: f32[128,384], index: 6, kind: input, shape index: {}]   ;;  %s3050_s7 = inlined_call_operand.vmem [shape: f32[1,384], index: 7, kind: input, shape index: {}]   ;;  %s3051_s8 = inlined_call_operand.hbm [shape: f32[128,128], index: 8, kind: input, shape index: {}]   ;;  %s3052_s9 = inlined_call_operand.vmem [shape: f32[1,128], index: 9, kind: input, shape index: {}]   ;;  %s3053_s10 = inlined_call_operand.hbm [shape: f32[128,128], index: 10, kind: input, shape index: {}]   ;;  %s3054_s11 = inlined_call_operand.vmem [shape: f32[1,128], index: 11, kind: input, shape index: {}]   ;;  %s3055_s12 = inlined_call_operand.hbm [shape: f32[128,128], index: 12, kind: input, shape index: {}]   ;;  %s3056_s13 = inlined_call_operand.vmem [shape: f32[1,128], index: 13, kind: input, shape index: {}]   ;;  %s3057_s14 = inlined_call_operand.hbm [shape: f32[128,128], index: 14, kind: input, shape index: {}]   ;;  %s3058_s15 = inlined_call_operand.vmem [shape: f32[1,128], index: 15, kind: input, shape index: {}]   ;;  %s3059_s16 = inlined_call_operand.hbm [shape: f32[128,128], index: 16, kind: input, shape index: {}]   ;;  %s3060_s17 = inlined_call_operand.vmem [shape: f32[1,128], index: 17, kind: input, shape index: {}]   ;;  %s3061_s18 = inlined_call_operand.hbm [shape: f32[128,128], index: 18, kind: input, shape index: {}]   ;;  %s3062_s19 = inlined_call_operand.vmem [shape: f32[1,128], index: 19, kind: input, shape index: {}]   ;;  %s3063_s20 = inlined_call_operand.hbm [shape: f32[128,256], index: 20, kind: input, shape index: {}]   ;;  %s3064_s21 = inlined_call_operand.vmem [shape: f32[1,256], index: 21, kind: input, shape index: {}]   ;;  %s3065_s22 = inlined_call_operand.hbm [shape: f32[2,256], index: 22, kind: output, shape index: {}]  }
   0x1   :  { %3071 = sst [smem:[#allocation24_spill]] %s3043_s0 }
   0x2   :  { %3072 = sst [smem:[#allocation25_spill]] %s3044_s1 }
   0x3   :  { %3073 = sst [smem:[#allocation26_spill]] %s3045_s2 }
   0x4   :  { %3074 = sst [smem:[#allocation27_spill]] %s3046_s3 }
   0x5   :  { %3075 = sst [smem:[#allocation28_spill]] %s3047_s4 }
   0x6   :  { %3076 = sst [smem:[#allocation29_spill]] %s3048_s5 }
   0x7   :  { %3077 = sst [smem:[#allocation30_spill]] %s3049_s6 }
   0x8   :  { %3078 = sst [smem:[#allocation31_spill]] %s3064_s21 }
   0x9   :  { %3079 = sst [smem:[#allocation32_spill]] %s3065_s22 }
   0xa   :  { %27 = vsyncpa [#allocation3], 0 }
   0xb   :  { %28 = vsyncpa [#allocation6], 0 }
   0xc   :  { %29 = vsyncpa [#allocation9], 0 }
   0xd   :  { %30 = vsyncpa [#allocation12], 0 }
   0xe   :  { %31 = vsyncpa [#allocation15], 0 }
   0xf   :  { %32 = vsyncpa [#allocation4], 0  ;;  %s2604_s3 = smov [#allocation5]   ;;  %s3080_s4 = sld [smem:[#allocation30_spill]] }
  0x10   :  { %s60_s28 = sshll.u32 %s2604_s3, 4  ;;  %s61_s28 = int_to_ptr.vmem [resolvable:$true] %s60_s28 }
  0x15   :  { %s2372_s0 = scalar_lea.hbm %s3080_s4, 6144 }
  0x16   :  { %p2373_p0 = scmp.ne.s32.totalorder %s3080_s4, %s2372_s0  ;;  %p2376_p1 = scmp.lt.u32.totalorder %s2372_s0, %s3080_s4 }
  0x18   :  { %p2378_p2 = pnand %p2376_p1, %p2373_p0 }
  0x1a   :  { %2381 = shalt.err (!%p2378_p2)
}
  0x1b   :  { %s2382_s6 = scalar_lea.vmem %s61_s28, 6144  ;;  %p2387_p4 = scmp.lt.s32.totalorder %s61_s28, %s61_s28 }
  0x1c   :  { %p2383_p3 = scmp.ne.s32.totalorder %s61_s28, %s2382_s6  ;;  %p2388_p5 = scmp.lt.s32.totalorder %s2382_s6, %s2382_s6 }
  0x1e   :  { %p2389_p6 = por %p2388_p5, %p2387_p4 }
  0x20   :  { %p2390_p7 = pnand %p2389_p6, %p2383_p3 }
  0x22   :  { %2393 = shalt.err (!%p2390_p7)
}
  0x23   :  { %s2605_s25 = smov 384   ;;  %s2606_s26 = smov 24  }
  0x24   :  { %66 = dma.hbm_to_vmem [thread:$0]  %s3080_s4, 6144, %s61_s28, [#allocation6], %s2605_s25, %s2605_s25, %s2606_s26  }
  0x25   :  { %s2607_s3 = smov [#allocation8]   ;;  %s2608_s30 = smov [#allocation11]  }
  0x26   :  { %s88_s29 = sshll.u32 %s2607_s3, 4  ;;  %s116_s0 = sshll.u32 %s2608_s30, 4  ;;  %s89_s29 = int_to_ptr.vmem [resolvable:$true] %s88_s29  ;;  %s117_s0 = int_to_ptr.vmem [resolvable:$true] %s116_s0 }
  0x27   :  { %s2394_s5 = scalar_lea.hbm %s3053_s10, 2048 }
  0x28   :  { %p2395_p8 = scmp.ne.s32.totalorder %s3053_s10, %s2394_s5  ;;  %p2398_p9 = scmp.lt.u32.totalorder %s2394_s5, %s3053_s10 }
  0x2a   :  { %p2400_p10 = pnand %p2398_p9, %p2395_p8 }
  0x2c   :  { %2403 = shalt.err (!%p2400_p10)
}
  0x2d   :  { %s2404_s28 = scalar_lea.vmem %s89_s29, 2048  ;;  %p2409_p12 = scmp.lt.s32.totalorder %s89_s29, %s89_s29 }
  0x2e   :  { %p2405_p11 = scmp.ne.s32.totalorder %s89_s29, %s2404_s28  ;;  %p2410_p13 = scmp.lt.s32.totalorder %s2404_s28, %s2404_s28 }
  0x30   :  { %p2411_p0 = por %p2410_p13, %p2409_p12 }
  0x32   :  { %p2412_p1 = pnand %p2411_p0, %p2405_p11 }
  0x34   :  { %2415 = shalt.err (!%p2412_p1)
}
  0x35   :  { %s2609_s4 = smov 128   ;;  %s2610_s25 = smov 8  }
  0x36   :  { %94 = dma.hbm_to_vmem [thread:$0]  %s3053_s10, 2048, %s89_s29, [#allocation9], %s2609_s4, %s2609_s4, %s2610_s25  }
  0x37   :  { %s2416_s27 = scalar_lea.hbm %s3057_s14, 2048 }
  0x38   :  { %p2417_p2 = scmp.ne.s32.totalorder %s3057_s14, %s2416_s27  ;;  %p2420_p3 = scmp.lt.u32.totalorder %s2416_s27, %s3057_s14 }
  0x3a   :  { %p2422_p4 = pnand %p2420_p3, %p2417_p2 }
  0x3c   :  { %2425 = shalt.err (!%p2422_p4)
}
  0x3d   :  { %s2426_s5 = scalar_lea.vmem %s117_s0, 2048  ;;  %p2431_p6 = scmp.lt.s32.totalorder %s117_s0, %s117_s0 }
  0x3e   :  { %p2427_p5 = scmp.ne.s32.totalorder %s117_s0, %s2426_s5  ;;  %p2432_p7 = scmp.lt.s32.totalorder %s2426_s5, %s2426_s5 }
  0x40   :  { %p2433_p8 = por %p2432_p7, %p2431_p6 }
  0x42   :  { %p2434_p9 = pnand %p2433_p8, %p2427_p5 }
  0x44   :  { %2437 = shalt.err (!%p2434_p9)
}
  0x45   :  { %122 = dma.hbm_to_vmem [thread:$0]  %s3057_s14, 2048, %s117_s0, [#allocation12], %s2609_s4, %s2609_s4, %s2610_s25  }
  0x46   :  { %s2611_s24 = smov [#allocation14]   ;;  %s2612_s28 = smov [#allocation2]  }
  0x47   :  { %s144_s6 = sshll.u32 %s2611_s24, 4  ;;  %s40_s26 = sshll.u32 %s2612_s28, 4  ;;  %s145_s6 = int_to_ptr.vmem [resolvable:$true] %s144_s6  ;;  %s41_s26 = int_to_ptr.vmem [resolvable:$true] %s40_s26 }
  0x48   :  { %s2438_s22 = scalar_lea.hbm %s3061_s18, 2048 }
  0x49   :  { %p2439_p10 = scmp.ne.s32.totalorder %s3061_s18, %s2438_s22  ;;  %p2442_p11 = scmp.lt.u32.totalorder %s2438_s22, %s3061_s18 }
  0x4b   :  { %p2444_p12 = pnand %p2442_p11, %p2439_p10 }
  0x4d   :  { %2447 = shalt.err (!%p2444_p12)
}
  0x4e   :  { %s2448_s14 = scalar_lea.vmem %s145_s6, 2048  ;;  %p2453_p0 = scmp.lt.s32.totalorder %s145_s6, %s145_s6 }
  0x4f   :  { %p2449_p13 = scmp.ne.s32.totalorder %s145_s6, %s2448_s14  ;;  %p2454_p1 = scmp.lt.s32.totalorder %s2448_s14, %s2448_s14 }
  0x51   :  { %p2455_p2 = por %p2454_p1, %p2453_p0 }
  0x53   :  { %p2456_p3 = pnand %p2455_p2, %p2449_p13 }
  0x55   :  { %2459 = shalt.err (!%p2456_p3)
}
  0x56   :  { %150 = dma.hbm_to_vmem [thread:$0]  %s3061_s18, 2048, %s145_s6, [#allocation15], %s2609_s4, %s2609_s4, %s2610_s25  }
  0x57   :  { %s3081_s29 = sld [smem:[#allocation25_spill]] }
  0x5d   :  { %s2460_s24 = scalar_lea.hbm %s3081_s29, 512 }
  0x5e   :  { %p2461_p4 = scmp.ne.s32.totalorder %s3081_s29, %s2460_s24  ;;  %p2464_p5 = scmp.lt.u32.totalorder %s2460_s24, %s3081_s29 }
  0x60   :  { %p2466_p6 = pnand %p2464_p5, %p2461_p4 }
  0x62   :  { %2469 = shalt.err (!%p2466_p6)
}
  0x63   :  { %s2470_s27 = scalar_lea.vmem %s41_s26, 512  ;;  %p2475_p8 = scmp.lt.s32.totalorder %s41_s26, %s41_s26 }
  0x64   :  { %p2471_p7 = scmp.ne.s32.totalorder %s41_s26, %s2470_s27  ;;  %p2476_p9 = scmp.lt.s32.totalorder %s2470_s27, %s2470_s27 }
  0x66   :  { %p2477_p10 = por %p2476_p9, %p2475_p8 }
  0x68   :  { %p2478_p11 = pnand %p2477_p10, %p2471_p7 }
  0x6a   :  { %2481 = shalt.err (!%p2478_p11)
}
  0x6b   :  { %46 = dma.hbm_to_vmem [thread:$0]  %s3081_s29, 512, %s41_s26, [#allocation3], %s2609_s4, %s2609_s4, %s2610_s25  }
  0x6c   :  { %s2613_s3 = smov [#allocation7]   ;;  %s2614_s23 = smov [#allocation10]  }
  0x6d   :  { %s74_s30 = sshll.u32 %s2613_s3, 4  ;;  %s102_s14 = sshll.u32 %s2614_s23, 4  ;;  %s75_s30 = int_to_ptr.vmem [resolvable:$true] %s74_s30  ;;  %s103_s14 = int_to_ptr.vmem [resolvable:$true] %s102_s14 }
  0x6e   :  { %s2482_s5 = scalar_lea.hbm %s3051_s8, 2048 }
  0x6f   :  { %p2483_p12 = scmp.ne.s32.totalorder %s3051_s8, %s2482_s5  ;;  %p2486_p13 = scmp.lt.u32.totalorder %s2482_s5, %s3051_s8 }
  0x71   :  { %p2488_p0 = pnand %p2486_p13, %p2483_p12 }
  0x73   :  { %2491 = shalt.err (!%p2488_p0)
}
  0x74   :  { %s2492_s26 = scalar_lea.vmem %s75_s30, 2048  ;;  %p2497_p2 = scmp.lt.s32.totalorder %s75_s30, %s75_s30 }
  0x75   :  { %p2493_p1 = scmp.ne.s32.totalorder %s75_s30, %s2492_s26  ;;  %p2498_p3 = scmp.lt.s32.totalorder %s2492_s26, %s2492_s26 }
  0x77   :  { %p2499_p4 = por %p2498_p3, %p2497_p2 }
  0x79   :  { %p2500_p5 = pnand %p2499_p4, %p2493_p1 }
  0x7b   :  { %2503 = shalt.err (!%p2500_p5)
}
  0x7c   :  { %80 = dma.hbm_to_vmem [thread:$0]  %s3051_s8, 2048, %s75_s30, [#allocation6], %s2609_s4, %s2609_s4, %s2610_s25  }
  0x7d   :  { %s2504_s18 = scalar_lea.hbm %s3055_s12, 2048 }
  0x7e   :  { %p2505_p6 = scmp.ne.s32.totalorder %s3055_s12, %s2504_s18  ;;  %p2508_p7 = scmp.lt.u32.totalorder %s2504_s18, %s3055_s12 }
  0x80   :  { %p2510_p8 = pnand %p2508_p7, %p2505_p6 }
  0x82   :  { %2513 = shalt.err (!%p2510_p8)
}
  0x83   :  { %s2514_s1 = scalar_lea.vmem %s103_s14, 2048  ;;  %p2519_p10 = scmp.lt.s32.totalorder %s103_s14, %s103_s14 }
  0x84   :  { %p2515_p9 = scmp.ne.s32.totalorder %s103_s14, %s2514_s1  ;;  %p2520_p11 = scmp.lt.s32.totalorder %s2514_s1, %s2514_s1 }
  0x86   :  { %p2521_p12 = por %p2520_p11, %p2519_p10 }
  0x88   :  { %p2522_p13 = pnand %p2521_p12, %p2515_p9 }
  0x8a   :  { %2525 = shalt.err (!%p2522_p13)
}
  0x8b   :  { %108 = dma.hbm_to_vmem [thread:$0]  %s3055_s12, 2048, %s103_s14, [#allocation9], %s2609_s4, %s2609_s4, %s2610_s25  }
  0x8c   :  { %s2615_s5 = smov [#allocation13]   ;;  %s2616_s24 = smov [#allocation16]  }
  0x8d   :  { %s130_s10 = sshll.u32 %s2615_s5, 4  ;;  %s158_s28 = sshll.u32 %s2616_s24, 4  ;;  %s131_s10 = int_to_ptr.vmem [resolvable:$true] %s130_s10  ;;  %s159_s28 = int_to_ptr.vmem [resolvable:$true] %s158_s28 }
  0x8e   :  { %s2526_s29 = scalar_lea.hbm %s3059_s16, 2048 }
  0x8f   :  { %p2527_p0 = scmp.ne.s32.totalorder %s3059_s16, %s2526_s29  ;;  %p2530_p1 = scmp.lt.u32.totalorder %s2526_s29, %s3059_s16 }
  0x91   :  { %p2532_p2 = pnand %p2530_p1, %p2527_p0 }
  0x93   :  { %2535 = shalt.err (!%p2532_p2)
}
  0x94   :  { %s2536_s12 = scalar_lea.vmem %s131_s10, 2048  ;;  %p2541_p4 = scmp.lt.s32.totalorder %s131_s10, %s131_s10 }
  0x95   :  { %p2537_p3 = scmp.ne.s32.totalorder %s131_s10, %s2536_s12  ;;  %p2542_p5 = scmp.lt.s32.totalorder %s2536_s12, %s2536_s12 }
  0x97   :  { %p2543_p6 = por %p2542_p5, %p2541_p4 }
  0x99   :  { %p2544_p7 = pnand %p2543_p6, %p2537_p3 }
  0x9b   :  { %2547 = shalt.err (!%p2544_p7)
}
  0x9c   :  { %136 = dma.hbm_to_vmem [thread:$0]  %s3059_s16, 2048, %s131_s10, [#allocation12], %s2609_s4, %s2609_s4, %s2610_s25  }
  0x9d   :  { %s2548_s0 = scalar_lea.hbm %s3063_s20, 4096 }
  0x9e   :  { %p2549_p8 = scmp.ne.s32.totalorder %s3063_s20, %s2548_s0  ;;  %p2552_p9 = scmp.lt.u32.totalorder %s2548_s0, %s3063_s20 }
  0xa0   :  { %p2554_p10 = pnand %p2552_p9, %p2549_p8 }
  0xa2   :  { %2557 = shalt.err (!%p2554_p10)
}
  0xa3   :  { %s2558_s24 = scalar_lea.vmem %s159_s28, 4096  ;;  %p2563_p12 = scmp.lt.s32.totalorder %s159_s28, %s159_s28 }
  0xa4   :  { %p2559_p11 = scmp.ne.s32.totalorder %s159_s28, %s2558_s24  ;;  %p2564_p13 = scmp.lt.s32.totalorder %s2558_s24, %s2558_s24 }
  0xa6   :  { %p2565_p0 = por %p2564_p13, %p2563_p12 }
  0xa8   :  { %p2566_p1 = pnand %p2565_p0, %p2559_p11 }
  0xaa   :  { %2569 = shalt.err (!%p2566_p1)
}
  0xab   :  { %s2617_s16 = smov 256   ;;  %s2618_s4 = smov 16  }
  0xac   :  { %164 = dma.hbm_to_vmem [thread:$0]  %s3063_s20, 4096, %s159_s28, [#allocation15], %s2617_s16, %s2617_s16, %s2618_s4  }
  0xad   :  { %2592 = dma.done.wait [#allocation3], 512  }
  0xae   :  { %2593 = vsyncadd [#allocation3], 4294966784 }
  0xaf   :  { %2594 = dma.done.wait [#allocation6], 8192  }
  0xb0   :  { %2595 = vsyncadd [#allocation6], 4294959104 }
  0xb1   :  { %2596 = dma.done.wait [#allocation9], 4096  }
  0xb2   :  { %2597 = vsyncadd [#allocation9], 4294963200 }
  0xb3   :  { %2598 = dma.done.wait [#allocation12], 4096  }
  0xb4   :  { %2599 = vsyncadd [#allocation12], 4294963200 }
  0xb5   :  { %2600 = dma.done.wait [#allocation15], 6144  }
  0xb6   :  { %2601 = vsyncadd [#allocation15], 4294961152  ;;  %v2619_v0 = vmov 0.0   ;;  %v208_v1 = vld [vmem:[#allocation5 + $0x8] sm:$0xff]  ;;  %v211_v2 = vld [vmem:[#allocation5 + $0x20] sm:$0xff]  ;;  %s3082_s2 = sld [smem:[#allocation24_spill]] }
  0xb7   :  { %336 = vmatprep.mubr.f32.mxu0 %v2619_v0  ;;  %v207_v3 = vld [vmem:[#allocation5] sm:$0xff]  ;;  %v2059_v4 = vpack.c.bf16 %v211_v2, %v208_v1  ;;  %v210_v5 = vld [vmem:[#allocation5 + $0x18] sm:$0xff]  ;;  %v217_v7 = vld [vmem:[#allocation5 + $0x50] sm:$0xff]  ;;  %s3083_s27 = sld [smem:[#allocation26_spill]]  ;;  %vm491_vm0 = vcmask 130048   ;;  %vm2620_vm1 = vmmov 0  }
  0xb8   :  { %v214_v6 = vld [vmem:[#allocation5 + $0x38] sm:$0xff]  ;;  %v2061_v8 = vpack.c.bf16 %v210_v5, %v207_v3  ;;  %v213_v10 = vld [vmem:[#allocation5 + $0x30] sm:$0xff]  ;;  %v216_v11 = vld [vmem:[#allocation5 + $0x48] sm:$0xff]  ;;  %s3084_s23 = sld [smem:[#allocation27_spill]]  ;;  %vm558_vm2 = vcmask 261120   ;;  %s3085_s25 = sld [smem:[#allocation29_spill]] }
  0xb9   :  { %v2063_v9 = vpack.c.bf16 %v217_v7, %v214_v6  ;;  %v220_v12 = vld [vmem:[#allocation5 + $0x68] sm:$0xff]  ;;  %2060 = vmatprep.subr.bf16.mxu0 %v2059_v4  ;;  %v223_v13 = vld [vmem:[#allocation5 + $0x80] sm:$0xff]  ;;  %v2065_v14 = vpack.c.bf16 %v216_v11, %v213_v10  ;;  %v222_v17 = vld [vmem:[#allocation5 + $0x78] sm:$0xff]  ;;  %s3086_s28 = sld [smem:[#allocation28_spill]]  ;;  %s3087_s29 = sld [smem:[#allocation31_spill]]  ;;  %vm1549_vm9 = vcmask 1041408  }
  0xba   :  { %2062 = vmatpush1.bf16.msra.mxu0 %v2061_v8  ;;  %v2067_v15 = vpack.c.bf16 %v223_v13, %v220_v12  ;;  %v219_v16 = vld [vmem:[#allocation5 + $0x60] sm:$0xff]  ;;  %v226_v18 = vld [vmem:[#allocation5 + $0x98] sm:$0xff]  ;;  %v229_v19 = vld [vmem:[#allocation5 + $0xb0] sm:$0xff]  ;;  %s2622_s21 = smov [#allocation17]  }
  0xbb   :  { %2064 = vmatprep.subr.bf16.mxu0 %v2063_v9  ;;  %v2069_v20 = vpack.c.bf16 %v222_v17, %v219_v16  ;;  %v2071_v21 = vpack.c.bf16 %v229_v19, %v226_v18  ;;  %v225_v22 = vld [vmem:[#allocation5 + $0x90] sm:$0xff]  ;;  %v228_v23 = vld [vmem:[#allocation5 + $0xa8] sm:$0xff]  ;;  %v235_v25 = vld [vmem:[#allocation5 + $0xe0] sm:$0xff]  ;;  %s1582_s22 = sshll.u32 %s2622_s21, 4  ;;  %s1583_s22 = int_to_ptr.vmem [resolvable:$true] %s1582_s22 }
  0xbc   :  { %v232_v24 = vld [vmem:[#allocation5 + $0xc8] sm:$0xff]  ;;  %v203_v26 = vld [vmem:[#allocation2] sm:$0xff]  ;;  %v2073_v27 = vpack.c.bf16 %v228_v23, %v225_v22  ;;  %v234_v30 = vld [vmem:[#allocation5 + $0xd8] sm:$0xff]  ;;  %p2575_p3 = scmp.lt.s32.totalorder %s1583_s22, %s1583_s22 }
  0xbd   :  { %1795 = vmatprep.mubr.f32.mxu1 %v203_v26  ;;  %v231_v28 = vld [vmem:[#allocation5 + $0xc0] sm:$0xff]  ;;  %v2075_v29 = vpack.c.bf16 %v235_v25, %v232_v24  ;;  %v238_v31 = vld [vmem:[#allocation5 + $0xf8] sm:$0xff]  ;;  %v241_v32 = vld [vmem:[#allocation5 + $0x110] sm:$0xff] }
  0xbe   :  { %2066 = vmatpush1.bf16.msra.mxu0 %v2065_v14  ;;  %v2077_v33 = vpack.c.bf16 %v234_v30, %v231_v28  ;;  %v2079_v34 = vpack.c.bf16 %v241_v32, %v238_v31  ;;  %v237_v35 = vld [vmem:[#allocation5 + $0xf0] sm:$0xff]  ;;  %v240_v36 = vld [vmem:[#allocation5 + $0x108] sm:$0xff]  ;;  %v247_v38 = vld [vmem:[#allocation5 + $0x140] sm:$0xff] }
  0xbf   :  { %2068 = vmatprep.subr.bf16.mxu0 %v2067_v15  ;;  %v244_v37 = vld [vmem:[#allocation5 + $0x128] sm:$0xff]  ;;  %v2081_v39 = vpack.c.bf16 %v240_v36, %v237_v35  ;;  %v243_v41 = vld [vmem:[#allocation5 + $0x120] sm:$0xff]  ;;  %v246_v42 = vld [vmem:[#allocation5 + $0x138] sm:$0xff] }
  0xc0   :  { %v2083_v40 = vpack.c.bf16 %v247_v38, %v244_v37  ;;  %v250_v43 = vld [vmem:[#allocation5 + $0x158] sm:$0xff]  ;;  %v253_v44 = vld [vmem:[#allocation5 + $0x170] sm:$0xff]  ;;  %v2085_v45 = vpack.c.bf16 %v246_v42, %v243_v41  ;;  %v252_v48 = vld [vmem:[#allocation5 + $0x168] sm:$0xff] }
  0xc1   :  { %v2087_v46 = vpack.c.bf16 %v253_v44, %v250_v43  ;;  %v249_v47 = vld [vmem:[#allocation5 + $0x150] sm:$0xff]  ;;  %v2871_v49 = vld [vmem:[%s3082_s2] sm:$0xff]  ;;  %v2876_v50 = vld [vmem:[%s3082_s2 + $0x8] sm:$0xff] }
  0xc2   :  { %2070 = vmatpush1.bf16.msra.mxu0 %v2069_v20  ;;  %v2089_v51 = vpack.c.bf16 %v252_v48, %v249_v47  ;;  %v480_v52 = vpack.c.bf16 %v2876_v50, %v2871_v49  ;;  %v2881_v53 = vld [vmem:[#allocation2 + $0x8] sm:$0xff]  ;;  %v205_v54 = vld [vmem:[#allocation2 + $0x10] sm:$0xff]  ;;  %v2887_v55 = vld [vmem:[#allocation2 + $0x18] sm:$0xff] }
  0xc3   :  { %2072 = vmatprep.subr.bf16.mxu0 %v2071_v21  ;;  %v2892_v56 = vld [vmem:[%s3083_s27] sm:$0xff]   ;;  %v2898_v57 = vld [vmem:[%s3083_s27 + $0x8] sm:$0xff]   ;;  %v209_v58 = vld [vmem:[#allocation5 + $0x10] sm:$0xff]  ;;  %s2570_s27 = scalar_lea.vmem %s1583_s22, 64 }
  0xc4   :  { %v212_v59 = vld [vmem:[#allocation5 + $0x28] sm:$0xff]  ;;  %v215_v60 = vld [vmem:[#allocation5 + $0x40] sm:$0xff]  ;;  %v218_v62 = vld [vmem:[#allocation5 + $0x58] sm:$0xff]  ;;  %p2571_p2 = scmp.ne.s32.totalorder %s1583_s22, %s2570_s27  ;;  %p2576_p4 = scmp.lt.s32.totalorder %s2570_s27, %s2570_s27 }
  0xc5   :  { %v2091_v61 = vpack.c.bf16 %v212_v59, %v209_v58  ;;  %v2095_v63 = vpack.c.bf16 %v218_v62, %v215_v60  ;;  %v221_v1 = vld [vmem:[#allocation5 + $0x70] sm:$0xff]  ;;  %v224_v2 = vld [vmem:[#allocation5 + $0x88] sm:$0xff]  ;;  %v227_v4 = vld [vmem:[#allocation5 + $0xa0] sm:$0xff] }
  0xc6   :  { %2074 = vmatpush1.bf16.msra.mxu0 %v2073_v27  ;;  %v2099_v3 = vpack.c.bf16 %v224_v2, %v221_v1  ;;  %v230_v5 = vld [vmem:[#allocation5 + $0xb8] sm:$0xff]  ;;  %v233_v7 = vld [vmem:[#allocation5 + $0xd0] sm:$0xff]  ;;  %v236_v8 = vld [vmem:[#allocation5 + $0xe8] sm:$0xff]  ;;  %p2577_p5 = por %p2576_p4, %p2575_p3 }
  0xc7   :  { %2076 = vmatprep.subr.bf16.mxu0 %v2075_v29  ;;  %2092 = vmatprep.subr.bf16.mxu1 %v2091_v61  ;;  %v2103_v6 = vpack.c.bf16 %v230_v5, %v227_v4  ;;  %v2107_v9 = vpack.c.bf16 %v236_v8, %v233_v7  ;;  %v239_v10 = vld [vmem:[#allocation5 + $0x100] sm:$0xff]  ;;  %v242_v11 = vld [vmem:[#allocation5 + $0x118] sm:$0xff]  ;;  %v245_v13 = vld [vmem:[#allocation5 + $0x130] sm:$0xff] }
  0xc8   :  { %2094 = vmatpush3.bf16.msra.mxu1 %v2091_v61  ;;  %v2111_v12 = vpack.c.bf16 %v242_v11, %v239_v10  ;;  %v248_v14 = vld [vmem:[#allocation5 + $0x148] sm:$0xff]  ;;  %v251_v16 = vld [vmem:[#allocation5 + $0x160] sm:$0xff]  ;;  %v254_v17 = vld [vmem:[#allocation5 + $0x178] sm:$0xff]  ;;  %p2578_p6 = pnand %p2577_p5, %p2571_p2 }
  0xc9   :  { %2096 = vmatprep.subr.bf16.mxu1 %v2095_v63  ;;  %v2115_v15 = vpack.c.bf16 %v248_v14, %v245_v13  ;;  %v2119_v18 = vpack.c.bf16 %v254_v17, %v251_v16  ;;  %v446_v19 = vld [vmem:[#allocation7] sm:$0xff]  ;;  %v447_v20 = vld [vmem:[#allocation7 + $0x8] sm:$0xff]  ;;  %v448_v22 = vld [vmem:[#allocation7 + $0x10] sm:$0xff] }
  0xca   :  { %2078 = vmatpush1.bf16.msra.mxu0 %v2077_v33  ;;  %v2123_v21 = vpack.c.bf16 %v447_v20, %v446_v19  ;;  %v449_v23 = vld [vmem:[#allocation7 + $0x18] sm:$0xff]  ;;  %v450_v25 = vld [vmem:[#allocation7 + $0x20] sm:$0xff]  ;;  %v452_v28 = vld [vmem:[#allocation7 + $0x30] sm:$0xff] }
  0xcb   :  { %2080 = vmatprep.subr.bf16.mxu0 %v2079_v34  ;;  %v2127_v24 = vpack.c.bf16 %v449_v23, %v448_v22  ;;  %v453_v29 = vld [vmem:[#allocation7 + $0x38] sm:$0xff]  ;;  %v454_v31 = vld [vmem:[#allocation7 + $0x40] sm:$0xff]  ;;  %v455_v32 = vld [vmem:[#allocation7 + $0x48] sm:$0xff] }
  0xcc   :  { %2098 = vmatpush3.bf16.msra.mxu1 %v2095_v63  ;;  %v2135_v30 = vpack.c.bf16 %v453_v29, %v452_v28  ;;  %v2139_v33 = vpack.c.bf16 %v455_v32, %v454_v31  ;;  %v456_v34 = vld [vmem:[#allocation7 + $0x50] sm:$0xff]  ;;  %v457_v35 = vld [vmem:[#allocation7 + $0x58] sm:$0xff]  ;;  %v458_v37 = vld [vmem:[#allocation7 + $0x60] sm:$0xff] }
  0xcd   :  { %2100 = vmatprep.subr.bf16.mxu1 %v2099_v3  ;;  %v2143_v36 = vpack.c.bf16 %v457_v35, %v456_v34  ;;  %v459_v38 = vld [vmem:[#allocation7 + $0x68] sm:$0xff]  ;;  %v2918_v48 = vld [vmem:[%s3050_s7] sm:$0x7]  ;;  %v460_v13 = vld [vmem:[#allocation7 + $0x70] sm:$0xff] }
  0xce   :  { %2082 = vmatpush1.bf16.msra.mxu0 %v2081_v39  ;;  %v2147_v39 = vpack.c.bf16 %v459_v38, %v458_v37  ;;  %v461_v14 = vld [vmem:[#allocation7 + $0x78] sm:$0xff]  ;;  %v463_v16 = vld [vmem:[#allocation8] sm:$0xff]  ;;  %v464_v17 = vld [vmem:[#allocation8 + $0x8] sm:$0xff] }
  0xcf   :  { %2084 = vmatprep.subr.bf16.mxu0 %v2083_v40  ;;  %v257_v40 = vlaneseq  ;;  %v2155_v19 = vpack.c.bf16 %v464_v17, %v463_v16  ;;  %v466_v20 = vld [vmem:[#allocation8 + $0x18] sm:$0xff]  ;;  %v467_v22 = vld [vmem:[#allocation8 + $0x20] sm:$0xff]  ;;  %v468_v23 = vld [vmem:[#allocation8 + $0x28] sm:$0xff] }
  0xd0   :  { %2102 = vmatpush3.bf16.msra.mxu1 %v2099_v3  ;;  %v471_v28 = vld [vmem:[#allocation8 + $0x40] sm:$0xff]  ;;  %v472_v29 = vld [vmem:[#allocation8 + $0x48] sm:$0xff]  ;;  %v473_v31 = vld [vmem:[#allocation8 + $0x50] sm:$0xff] }
  0xd1   :  { %2104 = vmatprep.subr.bf16.mxu1 %v2103_v6  ;;  %v2910_v43 = vshrl.u32 %v257_v40, 7  ;;  %v474_v32 = vld [vmem:[#allocation8 + $0x58] sm:$0xff]  ;;  %v475_v34 = vld [vmem:[#allocation8 + $0x60] sm:$0xff]  ;;  %v476_v35 = vld [vmem:[#allocation8 + $0x68] sm:$0xff] }
  0xd2   :  { %2086 = vmatpush1.bf16.msra.mxu0 %v2085_v45  ;;  %v777_v16 = vld [vmem:[#allocation10 + $0x10] sm:$0xff] }
  0xd3   :  { %2088 = vmatprep.subr.bf16.mxu0 %v2087_v46  ;;  %v259_v46 = vsub.s32 0, %v2910_v43 }
  0xd4   :  { %2106 = vmatpush3.bf16.msra.mxu1 %v2103_v6 }
  0xd5   :  { %2108 = vmatprep.subr.bf16.mxu1 %v2107_v9 }
  0xd6   :  { %2090 = vmatpush1.bf16.msra.mxu0 %v2089_v51 }
  0xd7   :  { %1801 = vmatprep.subr.bf16.mxu0 %v480_v52 }
  0xd8   :  { %2110 = vmatpush3.bf16.msra.mxu1 %v2107_v9 }
  0xd9   :  { %337 = vmatmul.mubr.f32.vlgmr.msra.gmra.mrb[0].mxu0 %v203_v26  ;;  %2112 = vmatprep.subr.bf16.mxu1 %v2111_v12  ;;  %v451_v26 = vld [vmem:[#allocation7 + $0x28] sm:$0xff] }
  0xda   :  { %1802 = vmatpush3.bf16.msra.mxu0 %v480_v52  ;;  %342 = vmatprep.mubr.f32.mxu0 %v2619_v0  ;;  %v2131_v27 = vpack.c.bf16 %v451_v26, %v450_v25  ;;  %v260_v52 = vrot.slane %v2918_v48, %v259_v46  ;;  %v469_v25 = vld [vmem:[#allocation8 + $0x30] sm:$0xff]  ;;  %v470_v26 = vld [vmem:[#allocation8 + $0x38] sm:$0xff] }
  0xdb   :  { %1807 = vmatprep.subr.bf16.mxu0 %v2619_v0 }
  0xdc   :  { %2114 = vmatpush3.bf16.msra.mxu1 %v2111_v12  ;;  %v2931_v12 = vld [vmem:[%s3084_s23] sm:$0xff]  }
  0xdd   :  { %343 = vmatmul.mubr.f32.gmra.mrb[2].mxu0 %v2881_v53  ;;  %2116 = vmatprep.subr.bf16.mxu1 %v2115_v15 }
  0xde   :  { %348 = vmatprep.mubr.f32.mxu0 %v2619_v0 }
  0xe0   :  { %2118 = vmatpush3.bf16.msra.mxu1 %v2115_v15  ;;  %v2151_v15 = vpack.c.bf16 %v461_v14, %v460_v13  ;;  %v775_v14 = vld [vmem:[#allocation10] sm:$0xff] }
  0xe1   :  { %349 = vmatmul.mubr.f32.gmra.mrb[4].mxu0 %v205_v54  ;;  %2120 = vmatprep.subr.bf16.mxu1 %v2119_v18 }
  0xe2   :  { %354 = vmatprep.mubr.f32.mxu0 %v2619_v0 }
  0xe4   :  { %2122 = vmatpush3.bf16.msra.mxu1 %v2119_v18  ;;  %v465_v18 = vld [vmem:[#allocation8 + $0x10] sm:$0xff] }
  0xe5   :  { %355 = vmatmul.mubr.f32.gmra.mrb[6].mxu0 %v2887_v55  ;;  %2124 = vmatprep.subr.bf16.mxu1 %v2123_v21 }
  0xe6   :  { %1803 = vmatprep.mubr.msk.bf16.mxu0 %vm491_vm0, %v2892_v56 }
  0xe7   :  { %1796 = vmatmul.mubr.f32.vlgmr.msra.gmra.mrb[0].mxu1 %v2881_v53 }
  0xe8   :  { %2126 = vmatpush3.bf16.msra.mxu1 %v2123_v21  ;;  %1798 = vmatprep.mubr.f32.mxu1 %v205_v54  ;;  %v2159_v21 = vpack.c.bf16 %v466_v20, %v465_v18  ;;  %v778_v18 = vld [vmem:[#allocation10 + $0x18] sm:$0xff]  ;;  %v779_v20 = vld [vmem:[#allocation10 + $0x20] sm:$0xff] }
  0xe9   :  { %1804 = vmatmul.mubr.msk.bf16.vlgmr.msra.gmra.mrb[8].mxu0 %vm491_vm0, %v2898_v57  ;;  %2128 = vmatprep.subr.bf16.mxu1 %v2127_v24 }
  0xea   :  { %1811 = vmatprep.mubr.msk.bf16.mxu0 %vm2620_vm1, %v2619_v0 }
  0xeb   :  { %1799 = vmatmul.mubr.f32.gmra.mrb[2].mxu1 %v2887_v55 }
  0xec   :  { %2130 = vmatpush3.bf16.msra.mxu1 %v2127_v24  ;;  %v2163_v24 = vpack.c.bf16 %v468_v23, %v467_v22  ;;  %v781_v23 = vld [vmem:[#allocation10 + $0x30] sm:$0xff] }
  0xed   :  { %2132 = vmatprep.subr.bf16.mxu1 %v2131_v27 }
  0xf0   :  { %2134 = vmatpush3.bf16.msra.mxu1 %v2131_v27  ;;  %v2167_v27 = vpack.c.bf16 %v470_v26, %v469_v25  ;;  %v783_v26 = vld [vmem:[#allocation10 + $0x40] sm:$0xff] }
  0xf1   :  { %2136 = vmatprep.subr.bf16.mxu1 %v2135_v30 }
  0xf4   :  { %2138 = vmatpush3.bf16.msra.mxu1 %v2135_v30  ;;  %v2171_v30 = vpack.c.bf16 %v472_v29, %v471_v28  ;;  %v785_v29 = vld [vmem:[#allocation10 + $0x50] sm:$0xff] }
  0xf5   :  { %2140 = vmatprep.subr.bf16.mxu1 %v2139_v33 }
  0xf8   :  { %2142 = vmatpush3.bf16.msra.mxu1 %v2139_v33  ;;  %v2175_v33 = vpack.c.bf16 %v474_v32, %v473_v31  ;;  %v787_v32 = vld [vmem:[#allocation10 + $0x60] sm:$0xff] }
  0xf9   :  { %2144 = vmatprep.subr.bf16.mxu1 %v2143_v36 }
  0xfc   :  { %2146 = vmatpush3.bf16.msra.mxu1 %v2143_v36  ;;  %v2179_v36 = vpack.c.bf16 %v476_v35, %v475_v34  ;;  %v263_v35 = vsub.s32 1, %v2910_v43 }
  0xfd   :  { %2148 = vmatprep.subr.bf16.mxu1 %v2147_v39 }
 0x100   :  { %2150 = vmatpush3.bf16.msra.mxu1 %v2147_v39 }
 0x101   :  { %2152 = vmatprep.subr.bf16.mxu1 %v2151_v15 }
 0x104   :  { %2154 = vmatpush3.bf16.msra.mxu1 %v2151_v15  ;;  %v776_v15 = vld [vmem:[#allocation10 + $0x8] sm:$0xff] }
 0x105   :  { %1891 = vmatprep.subr.bf16.mxu1 %v2619_v0  ;;  %v2187_v17 = vpack.c.bf16 %v776_v15, %v775_v14  ;;  %v797_v14 = vld [vmem:[#allocation11 + $0x28] sm:$0xff] }
 0x1ac   :  { %v338_v41 = vpop.f32.mrb[0].mxu0 }
 0x1ad   :  { %v2908_v42 = vpop.f32.mrb[1].mxu0  ;;  %v339_v58 = vadd.f32 %v338_v41, %v260_v52 }
 0x1b0   :  { %v344_v44 = vpop.f32.mrb[2].mxu0 }
 0x1b1   :  { %v2912_v45 = vpop.f32.mrb[3].mxu0  ;;  %v345_v63 = vadd.f32 %v344_v44, %v260_v52 }
 0x1b4   :  { %v350_v47 = vpop.f32.mrb[4].mxu0 }
 0x1b5   :  { %v2920_v51 = vpop.f32.mrb[5].mxu0  ;;  %v351_v55 = vadd.f32 %v350_v47, %v260_v52 }
 0x1b8   :  { %v356_v53 = vpop.f32.mrb[6].mxu0 }
 0x1b9   :  { %v2925_v54 = vpop.f32.mrb[7].mxu0  ;;  %v357_v60 = vadd.f32 %v356_v53, %v260_v52 }
 0x1ba   :  { %v2936_v37 = vpop.f32.mrb[0].mxu1 }
 0x1bb   :  { %v2938_v38 = vpop.f32.mrb[1].mxu1 }
 0x1bc   :  { %v1805_v59 = vpop.f32.mrb[8].mxu0 }
 0x1bd   :  { %v541_v61 = vadd.f32 %v1805_v59, %v351_v55  ;;  %v532_v62 = vpop.f32.mrb[9].mxu0  ;;  %v478_v59 = vld [vmem:[#allocation8 + $0x78] sm:$0xff] }
 0x1be   :  { %v533_v1 = vadd.f32 %v532_v62, %v339_v58  ;;  %v1806_v2 = vpop.f32.mrb[10].mxu0  ;;  %v2940_v39 = vpop.f32.mrb[2].mxu1  ;;  %v477_v58 = vld [vmem:[#allocation8 + $0x70] sm:$0xff] }
 0x1bf   :  { %v544_v3 = vadd.f32 %v1806_v2, %v357_v60  ;;  %v535_v4 = vpop.f32.mrb[11].mxu0  ;;  %v549_v6 = vmax.f32 %v541_v61, 0.0  ;;  %v2942_v40 = vpop.f32.mrb[3].mxu1  ;;  %v2183_v60 = vpack.c.bf16 %v478_v59, %v477_v58  ;;  %v1601_v61 = vld [vmem:[%s3052_s9] ss:$0 sm:$0xff] }
 0x1c0   :  { %v536_v5 = vadd.f32 %v535_v4, %v345_v63  ;;  %v547_v8 = vmax.f32 %v533_v1, 0.0 }
 0x1c1   :  { %v550_v7 = vmax.f32 %v544_v3, 0.0  ;;  %v1602_v3 = vld [vmem:[%s3054_s11] ss:$0 sm:$0xff] }
 0x1c2   :  { %v548_v9 = vmax.f32 %v536_v5, 0.0 }
 0x1c3   :  { %v552_v10 = vpack.c.bf16 %v550_v7, %v549_v6 }
 0x1c4   :  { %v551_v11 = vpack.c.bf16 %v548_v9, %v547_v8 }
 0x1c6   :  { %1808 = vmatpush3.bf16.msra.mxu0 %v551_v11 }
 0x1c7   :  { %1809 = vmatprep.subr.bf16.mxu0 %v2619_v0 }
 0x1ca   :  { %1810 = vmatpush3.bf16.msra.mxu0 %v552_v10 }
 0x1cb   :  { %2156 = vmatprep.subr.bf16.mxu0 %v2155_v19 }
 0x1cd   :  { %1812 = vmatmul.mubr.msk.bf16.vlgmr.msra.gmra.mrb[12].mxu0 %vm558_vm2, %v2931_v12 }
 0x1ce   :  { %2158 = vmatpush3.bf16.msra.mxu0 %v2155_v19  ;;  %v2191_v19 = vpack.c.bf16 %v778_v18, %v777_v16  ;;  %v798_v16 = vld [vmem:[#allocation11 + $0x30] sm:$0xff] }
 0x1cf   :  { %2160 = vmatprep.subr.bf16.mxu0 %v2159_v21 }
 0x1d2   :  { %2162 = vmatpush3.bf16.msra.mxu0 %v2159_v21  ;;  %v780_v21 = vld [vmem:[#allocation10 + $0x28] sm:$0xff] }
 0x1d3   :  { %2164 = vmatprep.subr.bf16.mxu0 %v2163_v24  ;;  %v2195_v22 = vpack.c.bf16 %v780_v21, %v779_v20  ;;  %v801_v20 = vld [vmem:[#allocation11 + $0x48] sm:$0xff] }
 0x1d6   :  { %2166 = vmatpush3.bf16.msra.mxu0 %v2163_v24  ;;  %v782_v24 = vld [vmem:[#allocation10 + $0x38] sm:$0xff] }
 0x1d7   :  { %2168 = vmatprep.subr.bf16.mxu0 %v2167_v27  ;;  %v2199_v25 = vpack.c.bf16 %v782_v24, %v781_v23  ;;  %v803_v23 = vld [vmem:[#allocation11 + $0x58] sm:$0xff] }
 0x1da   :  { %2170 = vmatpush3.bf16.msra.mxu0 %v2167_v27  ;;  %v784_v27 = vld [vmem:[#allocation10 + $0x48] sm:$0xff] }
 0x1db   :  { %2172 = vmatprep.subr.bf16.mxu0 %v2171_v30  ;;  %v2203_v28 = vpack.c.bf16 %v784_v27, %v783_v26  ;;  %v805_v26 = vld [vmem:[#allocation11 + $0x68] sm:$0xff] }
 0x1de   :  { %2174 = vmatpush3.bf16.msra.mxu0 %v2171_v30  ;;  %v786_v30 = vld [vmem:[#allocation10 + $0x58] sm:$0xff] }
 0x1df   :  { %2176 = vmatprep.subr.bf16.mxu0 %v2175_v33  ;;  %v2207_v31 = vpack.c.bf16 %v786_v30, %v785_v29 }
 0x1e2   :  { %2178 = vmatpush3.bf16.msra.mxu0 %v2175_v33  ;;  %v788_v33 = vld [vmem:[#allocation10 + $0x68] sm:$0xff] }
 0x1e3   :  { %2180 = vmatprep.subr.bf16.mxu0 %v2179_v36  ;;  %v2211_v34 = vpack.c.bf16 %v788_v33, %v787_v32 }
 0x1e6   :  { %2182 = vmatpush3.bf16.msra.mxu0 %v2179_v36  ;;  %v264_v36 = vrot.slane %v2918_v48, %v263_v35 }
 0x1e7   :  { %2184 = vmatprep.subr.bf16.mxu0 %v2183_v60 }
 0x1e8   :  { %v347_v58 = vadd.f32 %v2912_v45, %v264_v36  ;;  %v790_v45 = vld [vmem:[#allocation10 + $0x78] sm:$0xff] }
 0x1ea   :  { %2186 = vmatpush3.bf16.msra.mxu0 %v2183_v60 }
 0x2a0   :  { %v596_v41 = vpop.f32.mrb[12].mxu0 }
 0x2a1   :  { %v603_v44 = vadd.f32 %v596_v41, %v2871_v49  ;;  %v1813_v47 = vpop.f32.mrb[13].mxu0  ;;  %v353_v41 = vadd.f32 %v2920_v51, %v264_v36 }
 0x2a2   :  { %v599_v52 = vpop.f32.mrb[14].mxu0 }
 0x2a3   :  { %v604_v53 = vadd.f32 %v599_v52, %v2876_v50  ;;  %v1814_v55 = vpop.f32.mrb[15].mxu0  ;;  %1847 = vmatprep.mubr.f32.mxu1 %v603_v44  ;;  %v341_v44 = vadd.f32 %v2908_v42, %v264_v36  ;;  %v359_v52 = vadd.f32 %v2925_v54, %v264_v36  ;;  %v789_v42 = vld [vmem:[#allocation10 + $0x70] sm:$0xff]  ;;  %v807_v36 = vld [vmem:[#allocation11 + $0x78] sm:$0xff] }
 0x2a4   :  { %v2215_v54 = vpack.c.bf16 %v790_v45, %v789_v42  ;;  %v1081_v45 = vld [vmem:[#allocation13 + $0x18] sm:$0xff] }
 0x2a5   :  { %1848 = vmatmul.mubr.f32.vlgmr.msra.gmra.mrb[4].mxu1 %v604_v53 }
 0x2a6   :  { %1895 = vmatprep.mubr.msk.bf16.mxu1 %vm2620_vm1, %v2619_v0 }
 0x378   :  { %v1849_v49 = vpop.f32.mrb[4].mxu1 }
 0x379   :  { %v683_v62 = vadd.f32 %v1849_v49, %v1601_v61  ;;  %v677_v63 = vpop.f32.mrb[5].mxu1 }
 0x37a   :  { %v678_v1 = vadd.f32 %v1601_v61, %v677_v63 }
 0x37b   :  { %v687_v2 = vmax.f32 %v683_v62, 0.0 }
 0x37c   :  { %v686_v50 = vmax.f32 %v678_v1, 0.0 }
 0x37e   :  { %1882 = vmatprep.mubr.f32.mxu0 %v686_v50 }
 0x37f   :  { %1883 = vmatmul.mubr.f32.vlgmr.msra.gmra.mrb[16].mxu0 %v687_v2 }
 0x380   :  { %1887 = vmatprep.mubr.msk.bf16.mxu0 %vm491_vm0, %v2892_v56 }
 0x452   :  { %v1884_v4 = vpop.f32.mrb[16].mxu0 }
 0x453   :  { %v766_v5 = vadd.f32 %v1884_v4, %v1602_v3  ;;  %v760_v6 = vpop.f32.mrb[17].mxu0  ;;  %v792_v4 = vld [vmem:[#allocation11] sm:$0xff] }
 0x454   :  { %v761_v7 = vadd.f32 %v1602_v3, %v760_v6  ;;  %v794_v6 = vld [vmem:[#allocation11 + $0x10] sm:$0xff] }
 0x455   :  { %vm770_vm3 = vcmp.gt.f32.partialorder %v766_v5, 0.0  ;;  %v772_v8 = vmul.f32 0.01, %v766_v5 }
 0x456   :  { %vm769_vm4 = vcmp.gt.f32.partialorder %v761_v7, 0.0  ;;  %v771_v9 = vmul.f32 0.01, %v761_v7 }
 0x457   :  { %v2956_v10 = vsel %vm770_vm3, %v766_v5, %v772_v8  ;;  %v793_v5 = vld [vmem:[#allocation11 + $0x8] sm:$0xff]  ;;  %v795_v8 = vld [vmem:[#allocation11 + $0x18] sm:$0xff] }
 0x458   :  { %v2958_v11 = vsel %vm769_vm4, %v761_v7, %v771_v9  ;;  %v2219_v7 = vpack.c.bf16 %v793_v5, %v792_v4  ;;  %v2223_v9 = vpack.c.bf16 %v795_v8, %v794_v6  ;;  %v1082_v4 = vld [vmem:[#allocation13 + $0x20] sm:$0xff]  ;;  %v1083_v5 = vld [vmem:[#allocation13 + $0x28] sm:$0xff]  ;;  %v1085_v8 = vld [vmem:[#allocation13 + $0x38] sm:$0xff] }
 0x459   :  { %v809_v13 = vpack.c.bf16 %v2956_v10, %v2958_v11  ;;  %v2259_v6 = vpack.c.bf16 %v1083_v5, %v1082_v4 }
 0x45b   :  { %1885 = vmatprep.subr.bf16.mxu0 %v809_v13 }
 0x45c   :  { %1886 = vmatpush3.bf16.msra.mxu0 %v809_v13  ;;  %v796_v13 = vld [vmem:[#allocation11 + $0x20] sm:$0xff] }
 0x45d   :  { %2188 = vmatprep.subr.bf16.mxu0 %v2187_v17  ;;  %v2227_v15 = vpack.c.bf16 %v797_v14, %v796_v13  ;;  %v1087_v13 = vld [vmem:[#allocation13 + $0x48] sm:$0xff] }
 0x45f   :  { %1888 = vmatmul.mubr.msk.bf16.vlgmr.msra.gmra.mrb[20].mxu0 %vm491_vm0, %v2898_v57 }
 0x460   :  { %2190 = vmatpush3.bf16.msra.mxu0 %v2187_v17  ;;  %v799_v17 = vld [vmem:[#allocation11 + $0x38] sm:$0xff] }
 0x461   :  { %2192 = vmatprep.subr.bf16.mxu0 %v2191_v19  ;;  %v2231_v18 = vpack.c.bf16 %v799_v17, %v798_v16  ;;  %v1089_v16 = vld [vmem:[#allocation13 + $0x58] sm:$0xff] }
 0x464   :  { %2194 = vmatpush3.bf16.msra.mxu0 %v2191_v19  ;;  %v800_v19 = vld [vmem:[#allocation11 + $0x40] sm:$0xff] }
 0x465   :  { %2196 = vmatprep.subr.bf16.mxu0 %v2195_v22  ;;  %v2235_v21 = vpack.c.bf16 %v801_v20, %v800_v19  ;;  %v1091_v19 = vld [vmem:[#allocation13 + $0x68] sm:$0xff] }
 0x468   :  { %2198 = vmatpush3.bf16.msra.mxu0 %v2195_v22  ;;  %v802_v22 = vld [vmem:[#allocation11 + $0x50] sm:$0xff] }
 0x469   :  { %2200 = vmatprep.subr.bf16.mxu0 %v2199_v25  ;;  %v2239_v24 = vpack.c.bf16 %v803_v23, %v802_v22 }
 0x46c   :  { %2202 = vmatpush3.bf16.msra.mxu0 %v2199_v25  ;;  %v804_v25 = vld [vmem:[#allocation11 + $0x60] sm:$0xff] }
 0x46d   :  { %2204 = vmatprep.subr.bf16.mxu0 %v2203_v28  ;;  %v2243_v27 = vpack.c.bf16 %v805_v26, %v804_v25 }
 0x470   :  { %2206 = vmatpush3.bf16.msra.mxu0 %v2203_v28 }
 0x471   :  { %2208 = vmatprep.subr.bf16.mxu0 %v2207_v31 }
 0x474   :  { %2210 = vmatpush3.bf16.msra.mxu0 %v2207_v31 }
 0x475   :  { %2212 = vmatprep.subr.bf16.mxu0 %v2211_v34 }
 0x478   :  { %2214 = vmatpush3.bf16.msra.mxu0 %v2211_v34  ;;  %v806_v34 = vld [vmem:[#allocation11 + $0x70] sm:$0xff] }
 0x479   :  { %2216 = vmatprep.subr.bf16.mxu0 %v2215_v54 }
 0x47c   :  { %2218 = vmatpush3.bf16.msra.mxu0 %v2215_v54 }
 0x532   :  { %v1889_v47 = vpop.f32.mrb[20].mxu0 }
 0x533   :  { %v853_v53 = vadd.f32 %v1889_v47, %v353_v41  ;;  %v844_v55 = vpop.f32.mrb[21].mxu0  ;;  %v2247_v41 = vpack.c.bf16 %v807_v36, %v806_v34 }
 0x534   :  { %v845_v59 = vadd.f32 %v844_v55, %v341_v44  ;;  %v1890_v60 = vpop.f32.mrb[22].mxu0  ;;  %v1606_v44 = vld [vmem:[%s3056_s13] ss:$0 sm:$0xff] }
 0x535   :  { %v856_v61 = vadd.f32 %v1890_v60, %v359_v52  ;;  %v847_v49 = vpop.f32.mrb[23].mxu0  ;;  %v861_v63 = vmax.f32 %v853_v53, 0.0 }
 0x536   :  { %v848_v62 = vadd.f32 %v847_v49, %v347_v58  ;;  %v859_v50 = vmax.f32 %v845_v59, 0.0 }
 0x537   :  { %v862_v1 = vmax.f32 %v856_v61, 0.0 }
 0x538   :  { %v860_v2 = vmax.f32 %v848_v62, 0.0 }
 0x539   :  { %v864_v3 = vpack.c.bf16 %v862_v1, %v861_v63 }
 0x53a   :  { %v863_v51 = vpack.c.bf16 %v860_v2, %v859_v50  ;;  %v1078_v2 = vld [vmem:[#allocation13] sm:$0xff] }
 0x53c   :  { %1892 = vmatpush3.bf16.msra.mxu1 %v863_v51  ;;  %v1080_v51 = vld [vmem:[#allocation13 + $0x10] sm:$0xff] }
 0x53d   :  { %1893 = vmatprep.subr.bf16.mxu1 %v2619_v0  ;;  %v2255_v54 = vpack.c.bf16 %v1081_v45, %v1080_v51  ;;  %v1106_v51 = vld [vmem:[#allocation14 + $0x58] sm:$0xff]  ;;  %v1107_v45 = vld [vmem:[#allocation14 + $0x60] sm:$0xff] }
 0x540   :  { %1894 = vmatpush3.bf16.msra.mxu1 %v864_v3  ;;  %v1079_v3 = vld [vmem:[#allocation13 + $0x8] sm:$0xff] }
 0x541   :  { %2220 = vmatprep.subr.bf16.mxu1 %v2219_v7  ;;  %v2251_v42 = vpack.c.bf16 %v1079_v3, %v1078_v2  ;;  %v1105_v3 = vld [vmem:[#allocation14 + $0x50] sm:$0xff] }
 0x543   :  { %1896 = vmatmul.mubr.msk.bf16.vlgmr.msra.gmra.mrb[8].mxu1 %vm558_vm2, %v2931_v12 }
 0x544   :  { %2222 = vmatpush3.bf16.msra.mxu1 %v2219_v7  ;;  %v1084_v7 = vld [vmem:[#allocation13 + $0x30] sm:$0xff] }
 0x545   :  { %2224 = vmatprep.subr.bf16.mxu1 %v2223_v9 }
 0x548   :  { %2226 = vmatpush3.bf16.msra.mxu1 %v2223_v9  ;;  %v1086_v9 = vld [vmem:[#allocation13 + $0x40] sm:$0xff] }
 0x549   :  { %2228 = vmatprep.subr.bf16.mxu1 %v2227_v15  ;;  %v2267_v14 = vpack.c.bf16 %v1087_v13, %v1086_v9  ;;  %v1109_v13 = vld [vmem:[#allocation14 + $0x70] sm:$0xff] }
 0x54c   :  { %2230 = vmatpush3.bf16.msra.mxu1 %v2227_v15  ;;  %v1088_v15 = vld [vmem:[#allocation13 + $0x50] sm:$0xff] }
 0x54d   :  { %2232 = vmatprep.subr.bf16.mxu1 %v2231_v18  ;;  %v2271_v17 = vpack.c.bf16 %v1089_v16, %v1088_v15  ;;  %v1611_v16 = vld [vmem:[%s3060_s17] ss:$0 sm:$0xff] }
 0x550   :  { %2234 = vmatpush3.bf16.msra.mxu1 %v2231_v18  ;;  %v1090_v18 = vld [vmem:[#allocation13 + $0x60] sm:$0xff] }
 0x551   :  { %2236 = vmatprep.subr.bf16.mxu1 %v2235_v21  ;;  %v2275_v20 = vpack.c.bf16 %v1091_v19, %v1090_v18 }
 0x554   :  { %2238 = vmatpush3.bf16.msra.mxu1 %v2235_v21  ;;  %v267_v21 = vsub.s32 2, %v2910_v43 }
 0x555   :  { %2240 = vmatprep.subr.bf16.mxu1 %v2239_v24 }
 0x556   :  { %v268_v22 = vrot.slane %v2918_v48, %v267_v21  ;;  %v1426_v21 = vld [vmem:[%s3085_s25] sm:$0x3] }
 0x558   :  { %2242 = vmatpush3.bf16.msra.mxu1 %v2239_v24  ;;  %v438_v23 = vadd.f32 %v2942_v40, %v268_v22  ;;  %v428_v24 = vadd.f32 %v2938_v38, %v268_v22  ;;  %v443_v26 = vadd.f32 %v2940_v39, %v268_v22  ;;  %v1092_v38 = vld [vmem:[#allocation13 + $0x70] sm:$0xff] }
 0x559   :  { %2244 = vmatprep.subr.bf16.mxu1 %v2243_v27 }
 0x55c   :  { %2246 = vmatpush3.bf16.msra.mxu1 %v2243_v27 }
 0x55d   :  { %2248 = vmatprep.subr.bf16.mxu1 %v2247_v41 }
 0x560   :  { %2250 = vmatpush3.bf16.msra.mxu1 %v2247_v41 }
 0x561   :  { %2252 = vmatprep.subr.bf16.mxu1 %v2251_v42 }
 0x616   :  { %v899_v28 = vpop.f32.mrb[8].mxu1 }
 0x617   :  { %v906_v29 = vadd.f32 %v899_v28, %v2958_v11  ;;  %v1897_v30 = vpop.f32.mrb[9].mxu1 }
 0x618   :  { %v902_v31 = vpop.f32.mrb[10].mxu1 }
 0x619   :  { %v907_v32 = vadd.f32 %v902_v31, %v2956_v10  ;;  %v1898_v33 = vpop.f32.mrb[11].mxu1  ;;  %1931 = vmatprep.mubr.f32.mxu0 %v906_v29  ;;  %v433_v29 = vadd.f32 %v2936_v37, %v268_v22  ;;  %v1093_v37 = vld [vmem:[#allocation13 + $0x78] sm:$0xff]  ;;  %v2621_v22 = vmov 0  }
 0x61a   :  { %v2279_v39 = vpack.c.bf16 %v1093_v37, %v1092_v38  ;;  %2366 = vset.pattern.permute.xlu0 %v2621_v22 }
 0x61b   :  { %1932 = vmatmul.mubr.f32.vlgmr.msra.gmra.mrb[18].mxu0 %v907_v32  ;;  %1429 = vperm.xlu0 %2366, %v1426_v21  }
 0x61c   :  { %1971 = vmatprep.mubr.msk.bf16.mxu0 %vm491_vm0, %v2892_v56  ;;  %v1607_v56 = vld [vmem:[%s3058_s15] ss:$0 sm:$0xff] }
 0x69a   :  { %v1430_v21 = vpop.permute.xlu0 %1429 }
 0x6ee   :  { %v1933_v11 = vpop.f32.mrb[18].mxu0 }
 0x6ef   :  { %v986_v47 = vadd.f32 %v1933_v11, %v1606_v44  ;;  %v980_v52 = vpop.f32.mrb[19].mxu0 }
 0x6f0   :  { %v981_v53 = vadd.f32 %v1606_v44, %v980_v52  ;;  %v1096_v52 = vld [vmem:[#allocation14 + $0x8] sm:$0xff] }
 0x6f1   :  { %v990_v55 = vmax.f32 %v986_v47, 0.0  ;;  %v1095_v47 = vld [vmem:[#allocation14] sm:$0xff] }
 0x6f2   :  { %v989_v10 = vmax.f32 %v981_v53, 0.0  ;;  %v1097_v53 = vld [vmem:[#allocation14 + $0x10] sm:$0xff] }
 0x6f4   :  { %1966 = vmatprep.mubr.f32.mxu1 %v989_v10  ;;  %v2283_v10 = vpack.c.bf16 %v1096_v52, %v1095_v47  ;;  %v1439_v47 = vld [vmem:[#allocation16 + $0x30] sm:$0xff]  ;;  %v1442_v52 = vld [vmem:[#allocation16 + $0x48] sm:$0xff] }
 0x6f5   :  { %1967 = vmatmul.mubr.f32.vlgmr.msra.gmra.mrb[6].mxu1 %v990_v55  ;;  %v1098_v55 = vld [vmem:[#allocation14 + $0x18] sm:$0xff] }
 0x6f6   :  { %2254 = vmatpush3.bf16.msra.mxu1 %v2251_v42  ;;  %v2303_v42 = vpack.c.bf16 %v1106_v51, %v1105_v3 }
 0x6f7   :  { %2256 = vmatprep.subr.bf16.mxu1 %v2255_v54 }
 0x6fa   :  { %2258 = vmatpush3.bf16.msra.mxu1 %v2255_v54  ;;  %v1108_v54 = vld [vmem:[#allocation14 + $0x68] sm:$0xff] }
 0x6fb   :  { %2260 = vmatprep.subr.bf16.mxu1 %v2259_v6  ;;  %v2307_v4 = vpack.c.bf16 %v1108_v54, %v1107_v45  ;;  %v1454_v45 = vld [vmem:[#allocation16 + $0xa8] sm:$0xff]  ;;  %v1456_v54 = vld [vmem:[#allocation16 + $0xb8] sm:$0xff] }
 0x6fe   :  { %2262 = vmatpush3.bf16.msra.mxu1 %v2259_v6 }
 0x7c8   :  { %v1968_v58 = vpop.f32.mrb[6].mxu1 }
 0x7c9   :  { %v1069_v59 = vadd.f32 %v1968_v58, %v1607_v56  ;;  %v1063_v60 = vpop.f32.mrb[7].mxu1  ;;  %v1099_v58 = vld [vmem:[#allocation14 + $0x20] sm:$0xff] }
 0x7ca   :  { %v1064_v61 = vadd.f32 %v1607_v56, %v1063_v60  ;;  %v2287_v56 = vpack.c.bf16 %v1098_v55, %v1097_v53  ;;  %v1444_v53 = vld [vmem:[#allocation16 + $0x58] sm:$0xff] }
 0x7cb   :  { %vm1073_vm5 = vcmp.gt.f32.partialorder %v1069_v59, 0.0  ;;  %v1075_v49 = vmul.f32 0.01, %v1069_v59  ;;  %v2323_v55 = vpack.c.bf16 %v1444_v53, %v1442_v52 }
 0x7cc   :  { %vm1072_vm6 = vcmp.gt.f32.partialorder %v1064_v61, 0.0  ;;  %v1074_v62 = vmul.f32 0.01, %v1064_v61 }
 0x7cd   :  { %v2985_v63 = vsel %vm1073_vm5, %v1069_v59, %v1075_v49  ;;  %v1100_v59 = vld [vmem:[#allocation14 + $0x28] sm:$0xff] }
 0x7ce   :  { %v2987_v1 = vsel %vm1072_vm6, %v1064_v61, %v1074_v62  ;;  %v2291_v60 = vpack.c.bf16 %v1100_v59, %v1099_v58  ;;  %v1102_v61 = vld [vmem:[#allocation14 + $0x38] sm:$0xff]  ;;  %v1103_v62 = vld [vmem:[#allocation14 + $0x40] sm:$0xff]  ;;  %v1443_v58 = vld [vmem:[#allocation16 + $0x50] sm:$0xff] }
 0x7cf   :  { %v1112_v50 = vpack.c.bf16 %v2985_v63, %v2987_v1  ;;  %v1446_v59 = vld [vmem:[#allocation16 + $0x68] sm:$0xff] }
 0x7d1   :  { %1969 = vmatprep.subr.bf16.mxu0 %v1112_v50 }
 0x7d2   :  { %1970 = vmatpush3.bf16.msra.mxu0 %v1112_v50  ;;  %v1104_v50 = vld [vmem:[#allocation14 + $0x48] sm:$0xff] }
 0x7d3   :  { %1975 = vmatprep.subr.bf16.mxu0 %v2619_v0  ;;  %v2299_v2 = vpack.c.bf16 %v1104_v50, %v1103_v62  ;;  %v1447_v62 = vld [vmem:[#allocation16 + $0x70] sm:$0xff]  ;;  %v1450_v50 = vld [vmem:[#allocation16 + $0x88] sm:$0xff] }
 0x7d5   :  { %1972 = vmatmul.mubr.msk.bf16.vlgmr.msra.gmra.mrb[24].mxu0 %vm491_vm0, %v2898_v57  ;;  %v2263_v57 = vpack.c.bf16 %v1085_v8, %v1084_v7 }
 0x7d6   :  { %1979 = vmatprep.mubr.msk.bf16.mxu0 %vm2620_vm1, %v2619_v0 }
 0x7d7   :  { %2264 = vmatprep.subr.bf16.mxu1 %v2263_v57 }
 0x7d8   :  { %2266 = vmatpush3.bf16.msra.mxu1 %v2263_v57 }
 0x7d9   :  { %2268 = vmatprep.subr.bf16.mxu1 %v2267_v14 }
 0x7dc   :  { %2270 = vmatpush3.bf16.msra.mxu1 %v2267_v14  ;;  %v1110_v14 = vld [vmem:[#allocation14 + $0x78] sm:$0xff] }
 0x7dd   :  { %2272 = vmatprep.subr.bf16.mxu1 %v2271_v17  ;;  %v2311_v15 = vpack.c.bf16 %v1110_v14, %v1109_v13  ;;  %v1457_v14 = vld [vmem:[#allocation16 + $0xc0] sm:$0xff] }
 0x7e0   :  { %2274 = vmatpush3.bf16.msra.mxu1 %v2271_v17 }
 0x7e1   :  { %2276 = vmatprep.subr.bf16.mxu1 %v2275_v20 }
 0x7e4   :  { %2278 = vmatpush3.bf16.msra.mxu1 %v2275_v20 }
 0x7e5   :  { %2280 = vmatprep.subr.bf16.mxu1 %v2279_v39 }
 0x7e8   :  { %2282 = vmatpush3.bf16.msra.mxu1 %v2279_v39  ;;  %v1437_v39 = vld [vmem:[#allocation16 + $0x20] sm:$0xff] }
 0x7e9   :  { %2053 = vmatprep.subr.bf16.mxu1 %v2619_v0 }
 0x8a8   :  { %v1973_v25 = vpop.f32.mrb[24].mxu0 }
 0x8a9   :  { %v1156_v27 = vadd.f32 %v1973_v25, %v438_v23  ;;  %v1147_v28 = vpop.f32.mrb[25].mxu0  ;;  %v1612_v23 = vld [vmem:[%s3062_s19] ss:$0 sm:$0xff] }
 0x8aa   :  { %v1148_v30 = vadd.f32 %v1147_v28, %v428_v24  ;;  %v1974_v31 = vpop.f32.mrb[26].mxu0 }
 0x8ab   :  { %v1159_v32 = vadd.f32 %v1974_v31, %v443_v26  ;;  %v1150_v33 = vpop.f32.mrb[27].mxu0  ;;  %v1164_v36 = vmax.f32 %v1156_v27, 0.0 }
 0x8ac   :  { %v1151_v34 = vadd.f32 %v1150_v33, %v433_v29  ;;  %v1162_v44 = vmax.f32 %v1148_v30, 0.0  ;;  %v1434_v29 = vld [vmem:[#allocation16 + $0x8] sm:$0xff]  ;;  %v1436_v30 = vld [vmem:[#allocation16 + $0x18] sm:$0xff] }
 0x8ad   :  { %v1165_v41 = vmax.f32 %v1159_v32, 0.0 }
 0x8ae   :  { %v1163_v48 = vmax.f32 %v1151_v34, 0.0  ;;  %v2315_v34 = vpack.c.bf16 %v1436_v30, %v1434_v29 }
 0x8af   :  { %v1167_v11 = vpack.c.bf16 %v1165_v41, %v1164_v36  ;;  %v1433_v36 = vld [vmem:[#allocation16] sm:$0xff]  ;;  %v1435_v41 = vld [vmem:[#allocation16 + $0x10] sm:$0xff] }
 0x8b0   :  { %v1166_v40 = vpack.c.bf16 %v1163_v48, %v1162_v44  ;;  %v1438_v48 = vld [vmem:[#allocation16 + $0x28] sm:$0xff]  ;;  %v2317_v38 = vpack.c.bf16 %v1435_v41, %v1433_v36 }
 0x8b2   :  { %1976 = vmatpush3.bf16.msra.mxu0 %v1166_v40  ;;  %v1381_v40 = vld [vmem:[%s3086_s28] sm:$0x1] }
 0x8b3   :  { %1977 = vmatprep.subr.bf16.mxu0 %v2619_v0 }
 0x8b6   :  { %1978 = vmatpush3.bf16.msra.mxu0 %v1167_v11  ;;  %v1440_v11 = vld [vmem:[#allocation16 + $0x38] sm:$0xff] }
 0x8b7   :  { %2284 = vmatprep.subr.bf16.mxu0 %v2283_v10  ;;  %v2319_v37 = vpack.c.bf16 %v1440_v11, %v1438_v48 }
 0x8b9   :  { %1980 = vmatmul.mubr.msk.bf16.vlgmr.msra.gmra.mrb[28].mxu0 %vm558_vm2, %v2931_v12  ;;  %v1101_v12 = vld [vmem:[#allocation14 + $0x30] sm:$0xff] }
 0x8ba   :  { %2286 = vmatpush3.bf16.msra.mxu0 %v2283_v10  ;;  %v2295_v49 = vpack.c.bf16 %v1102_v61, %v1101_v12  ;;  %v2321_v10 = vpack.c.bf16 %v1439_v47, %v1437_v39 }
 0x8bb   :  { %2288 = vmatprep.subr.bf16.mxu0 %v2287_v56 }
 0x8be   :  { %2290 = vmatpush3.bf16.msra.mxu0 %v2287_v56  ;;  %v1441_v56 = vld [vmem:[#allocation16 + $0x40] sm:$0xff] }
 0x8bf   :  { %2292 = vmatprep.subr.bf16.mxu0 %v2291_v60  ;;  %v2325_v12 = vpack.c.bf16 %v1443_v58, %v1441_v56 }
 0x8c2   :  { %2294 = vmatpush3.bf16.msra.mxu0 %v2291_v60  ;;  %v1448_v60 = vld [vmem:[#allocation16 + $0x78] sm:$0xff] }
 0x8c3   :  { %2296 = vmatprep.subr.bf16.mxu0 %v2295_v49  ;;  %v2327_v61 = vpack.c.bf16 %v1448_v60, %v1446_v59 }
 0x8c6   :  { %2298 = vmatpush3.bf16.msra.mxu0 %v2295_v49  ;;  %v1445_v49 = vld [vmem:[#allocation16 + $0x60] sm:$0xff] }
 0x8c7   :  { %2300 = vmatprep.subr.bf16.mxu0 %v2299_v2  ;;  %v2329_v3 = vpack.c.bf16 %v1447_v62, %v1445_v49 }
 0x8ca   :  { %2302 = vmatpush3.bf16.msra.mxu0 %v2299_v2  ;;  %v1452_v2 = vld [vmem:[#allocation16 + $0x98] sm:$0xff] }
 0x8cb   :  { %2304 = vmatprep.subr.bf16.mxu0 %v2303_v42  ;;  %v2331_v51 = vpack.c.bf16 %v1452_v2, %v1450_v50 }
 0x8ce   :  { %2306 = vmatpush3.bf16.msra.mxu0 %v2303_v42  ;;  %v1449_v42 = vld [vmem:[#allocation16 + $0x80] sm:$0xff] }
 0x8cf   :  { %2308 = vmatprep.subr.bf16.mxu0 %v2307_v4 }
 0x8d2   :  { %2310 = vmatpush3.bf16.msra.mxu0 %v2307_v4 }
 0x8d3   :  { %2312 = vmatprep.subr.bf16.mxu0 %v2311_v15 }
 0x8d6   :  { %2314 = vmatpush3.bf16.msra.mxu0 %v2311_v15  ;;  %v1459_v15 = vld [vmem:[#allocation16 + $0xd0] sm:$0xff] }
 0x98c   :  { %v1202_v5 = vpop.f32.mrb[28].mxu0 }
 0x98d   :  { %v1209_v6 = vadd.f32 %v1202_v5, %v2987_v1  ;;  %v1981_v7 = vpop.f32.mrb[29].mxu0  ;;  %v2335_v5 = vpack.c.bf16 %v1456_v54, %v1454_v45 }
 0x98e   :  { %v1205_v8 = vpop.f32.mrb[30].mxu0  ;;  %v1455_v7 = vld [vmem:[#allocation16 + $0xb0] sm:$0xff] }
 0x98f   :  { %v1210_v57 = vadd.f32 %v1205_v8, %v2985_v63  ;;  %v1982_v9 = vpop.f32.mrb[31].mxu0  ;;  %2015 = vmatprep.mubr.f32.mxu1 %v1209_v6  ;;  %v1453_v6 = vld [vmem:[#allocation16 + $0xa0] sm:$0xff]  ;;  %v1458_v8 = vld [vmem:[#allocation16 + $0xc8] sm:$0xff] }
 0x990   :  { %v2337_v9 = vpack.c.bf16 %v1455_v7, %v1453_v6 }
 0x991   :  { %2016 = vmatmul.mubr.f32.vlgmr.msra.gmra.mrb[12].mxu1 %v1210_v57  ;;  %v1460_v57 = vld [vmem:[#allocation16 + $0xd8] sm:$0xff] }
 0x992   :  { %2055 = vmatprep.mubr.msk.bf16.mxu1 %vm2620_vm1, %v2619_v0  ;;  %v2339_v13 = vpack.c.bf16 %v1460_v57, %v1458_v8 }
 0xa64   :  { %v2017_v1 = vpop.f32.mrb[12].mxu1 }
 0xa65   :  { %v1289_v17 = vadd.f32 %v2017_v1, %v1611_v16  ;;  %v1283_v18 = vpop.f32.mrb[13].mxu1  ;;  %v1464_v1 = vld [vmem:[#allocation16 + $0xf8] sm:$0xff] }
 0xa66   :  { %v1284_v19 = vadd.f32 %v1611_v16, %v1283_v18  ;;  %v1462_v16 = vld [vmem:[#allocation16 + $0xe8] sm:$0xff] }
 0xa67   :  { %v1293_v20 = vmax.f32 %v1289_v17, 0.0  ;;  %v2341_v17 = vpack.c.bf16 %v1459_v15, %v1457_v14  ;;  %v2343_v18 = vpack.c.bf16 %v1464_v1, %v1462_v16 }
 0xa68   :  { %v1292_v63 = vmax.f32 %v1284_v19, 0.0  ;;  %v1461_v19 = vld [vmem:[#allocation16 + $0xe0] sm:$0xff] }
 0xa6a   :  { %2050 = vmatprep.mubr.f32.mxu0 %v1292_v63  ;;  %v1463_v63 = vld [vmem:[#allocation16 + $0xf0] sm:$0xff] }
 0xa6b   :  { %2051 = vmatmul.mubr.f32.vlgmr.msra.gmra.mrb[32].mxu0 %v1293_v20  ;;  %v2345_v20 = vpack.c.bf16 %v1463_v63, %v1461_v19 }
 0xb3e   :  { %v2052_v24 = vpop.f32.mrb[32].mxu0 }
 0xb3f   :  { %v1372_v25 = vadd.f32 %v2052_v24, %v1612_v23  ;;  %v1366_v26 = vpop.f32.mrb[33].mxu0 }
 0xb40   :  { %v1367_v27 = vadd.f32 %v1612_v23, %v1366_v26 }
 0xb41   :  { %vm1376_vm7 = vcmp.gt.f32.partialorder %v1372_v25, 0.0  ;;  %v1378_v28 = vmul.f32 0.01, %v1372_v25 }
 0xb42   :  { %vm1375_vm8 = vcmp.gt.f32.partialorder %v1367_v27, 0.0  ;;  %v1377_v31 = vmul.f32 0.01, %v1367_v27 }
 0xb43   :  { %v1380_v32 = vsel %vm1376_vm7, %v1372_v25, %v1378_v28 }
 0xb44   :  { %v1379_v33 = vsel %vm1375_vm8, %v1367_v27, %v1377_v31  ;;  %v1465_v27 = vld [vmem:[%s3087_s29] sm:$0x3] }
 0xb45   :  { %v1382_v44 = vpack.c.bf16 %v1380_v32, %v1379_v33  ;;  %v1470_v28 = vrot.slane %v1465_v27, %v259_v46  ;;  %v1474_v41 = vrot.slane %v1465_v27, %v263_v35 }
 0xb47   :  { %2054 = vmatpush3.bf16.msra.mxu1 %v1382_v44 }
 0xb48   :  { %2316 = vmatprep.subr.bf16.mxu1 %v2315_v34 }
 0xb4a   :  { %2056 = vmatmul.mubr.msk.bf16.vlgmr.msra.gmra.mrb[16].mxu1 %vm491_vm0, %v1381_v40 }
 0xb4b   :  { %2318 = vmatpush1.bf16.msra.mxu1 %v2317_v38  ;;  %1541 = vmatprep.mubr.f32.mxu1 %v2619_v0  ;;  %v1451_v0 = vld [vmem:[#allocation16 + $0x90] sm:$0xff] }
 0xb4c   :  { %2320 = vmatprep.subr.bf16.mxu1 %v2319_v37  ;;  %v2333_v4 = vpack.c.bf16 %v1451_v0, %v1449_v42 }
 0xb4f   :  { %2322 = vmatpush1.bf16.msra.mxu1 %v2321_v10 }
 0xb50   :  { %2324 = vmatprep.subr.bf16.mxu1 %v2323_v55 }
 0xb53   :  { %2326 = vmatpush1.bf16.msra.mxu1 %v2325_v12 }
 0xb54   :  { %2328 = vmatprep.subr.bf16.mxu1 %v2327_v61 }
 0xb57   :  { %2330 = vmatpush1.bf16.msra.mxu1 %v2329_v3 }
 0xb58   :  { %2332 = vmatprep.subr.bf16.mxu1 %v2331_v51 }
 0xb5b   :  { %2334 = vmatpush1.bf16.msra.mxu1 %v2333_v4 }
 0xb5c   :  { %2336 = vmatprep.subr.bf16.mxu1 %v2335_v5 }
 0xb5f   :  { %2338 = vmatpush1.bf16.msra.mxu1 %v2337_v9 }
 0xb60   :  { %2340 = vmatprep.subr.bf16.mxu1 %v2339_v13 }
 0xb63   :  { %2342 = vmatpush1.bf16.msra.mxu1 %v2341_v17 }
 0xb64   :  { %2344 = vmatprep.subr.bf16.mxu1 %v2343_v18 }
 0xb67   :  { %2346 = vmatpush1.bf16.msra.mxu1 %v2345_v20 }
 0xc1d   :  { %v1420_v22 = vpop.f32.mrb[16].mxu1 }
 0xc1e   :  { %v1432_v23 = vmul.f32 %v1430_v21, %v1420_v22  ;;  %v2057_v24 = vpop.f32.mrb[17].mxu1 }
 0xc1f   :  { %v1423_v25 = vpop.f32.mrb[18].mxu1 }
 0xc20   :  { %v2058_v26 = vpop.f32.mrb[19].mxu1  ;;  %1542 = vmatmul.mubr.f32.vlgmr.msra.gmra.mrb[14].mxu1 %v1432_v23 }
 0xcf3   :  { %v1543_v29 = vpop.f32.mrb[14].mxu1 }
 0xcf4   :  { %v1544_v30 = vadd.f32 %v1543_v29, %v1470_v28  ;;  %v1545_v31 = vpop.f32.mrb[15].mxu1 }
 0xcf5   :  { %v1546_v48 = vadd.f32 %v1545_v31, %v1474_v41 }
 0xcf6   :  { %v1548_v32 = vmul.f32 %v1544_v30, %v1544_v30 }
 0xcf8   :  { %v1550_v33 = vsel %vm1549_vm9, %v1548_v32, 0.0 }
 0xcf9   :  { %1551 = vadd.xlane.f32.xlu0 %v1550_v33 }
 0xd86   :  { %v1552_v34 = vpop.xlane.xlu0 %1551 }
 0xd87   :  { %v1553_v36 = vmax.f32 %v1552_v34, 1e-24 }
 0xd89   :  { %2370 = vrsqrt.f32 %v1553_v36 }
 0xd93   :  { %v2371_v44 = vpop.eup %2370 }
 0xd94   :  { %v1562_v11 = vmul.f32 %v2371_v44, %v1544_v30 }
 0xd96   :  { %v1566_v40 = vcombine.low %v1562_v11, %v1546_v48 }
 0xd98   :  { %1614 = vst.sshfl [vmem:[#allocation17] sm:$0x33 pattern:$0x76325410] %v1566_v40 }
 0xd99   :  { %2581 = shalt.err (!%p2578_p6)
}
 0xd9a   :  { %s3088_s14 = sld [smem:[#allocation32_spill]] }
 0xda0   :  { %s2582_s6 = scalar_lea.hbm %s3088_s14, 64 }
 0xda1   :  { %p2583_p7 = scmp.ne.s32.totalorder %s3088_s14, %s2582_s6  ;;  %p2586_p8 = scmp.lt.u32.totalorder %s2582_s6, %s3088_s14 }
 0xda3   :  { %p2588_p9 = pnand %p2586_p8, %p2583_p7 }
 0xda5   :  { %2591 = shalt.err (!%p2588_p9)
}
 0xda6   :  { %1585 = dma.vmem_to_hbm [thread:$0]  %s1583_s22, 64, %s3088_s14, [#allocation4]  }
 0xda7   :  { %2602 = dma.done.wait [#allocation4], 64  }
 0xda8   :  { %2603 = vsyncadd [#allocation4], 4294967232 }
 0xda9   :  { %1589 = vsyncpa [#allocation3], 1 }
 0xdaa   :  { %1590 = vsyncpa [#allocation6], 1 }
 0xdab   :  { %1591 = vsyncpa [#allocation9], 1 }
 0xdac   :  { %1592 = vsyncpa [#allocation12], 1 }
 0xdad   :  { %1593 = vsyncpa [#allocation15], 1 }
 0xdae   :  { %1594 = vsyncpa [#allocation4], 1 }

</bundles_post_ra>
